<compile_context>
chip_gen: v7x
topology: tpu7x:2x2x1
jax: 0.10.0
libtpu: 0.0.40
codegen_flags: <defaults>
</compile_context>

<pallas_src>
import functools
import math

import jax
import jax.numpy as jnp
from jax.experimental import pallas as pl
from jax.experimental.pallas import tpu as pltpu


def sir_fused_kernel(x_ref, win_ref, bin_ref, wo_ref, bo_ref,
                     w1_ref, b1_ref, w2_ref, b2_ref,
                     g1_ref, beta1_ref, g2_ref, beta2_ref,
                     o_ref, x_scr, *, num_heads, eps=1e-5):
    """One grid step = one TransformerEncoderLayer applied to one batch tile.

    Grid: (batch_tiles, num_layers); layer axis iterates fastest.
    x_scr keeps the activation resident in VMEM across the layer axis.
    """
    l = pl.program_id(1)
    TB, S, D = x_ref.shape
    BS = TB * S
    H = num_heads
    hd = D // H
    scale = 1.0 / math.sqrt(hd)
    bf16 = jnp.bfloat16
    f32 = jnp.float32

    # Load the input activation into the resident scratch at the first layer.
    @pl.when(l == 0)
    def _():
        x_scr[...] = x_ref[...].reshape(BS, D).astype(f32)

    x = x_scr[...]                                   # (BS, D) f32
    x_b = x.astype(bf16)

    # ---- multi-head self-attention (fused QKV proj, weights pre-transposed) --
    qkv = jnp.dot(x_b, win_ref[0], preferred_element_type=f32) + bin_ref[0]
    q = qkv[:, 0 * D:1 * D].reshape(TB, S, D)
    k = qkv[:, 1 * D:2 * D].reshape(TB, S, D)
    v = qkv[:, 2 * D:3 * D].reshape(TB, S, D)

    head_outs = []
    for h in range(H):                               # static unroll, H small
        sl = slice(h * hd, (h + 1) * hd)
        qh = q[:, :, sl].astype(bf16)                # (TB, S, hd)
        kh = k[:, :, sl].astype(bf16)
        vh = v[:, :, sl].astype(bf16)
        # batched over TB, contraction on head dim (no explicit transpose)
        s = jnp.einsum('bqd,bkd->bqk', qh, kh,
                       preferred_element_type=f32) * scale        # (TB, S, S)
        s = s - jnp.max(s, axis=-1, keepdims=True)
        p = jnp.exp(s)
        p = p * pl.reciprocal(jnp.sum(p, axis=-1, keepdims=True), approx=True)
        oh = jnp.einsum('bqk,bkd->bqd', p.astype(bf16), vh,
                        preferred_element_type=f32)               # (TB, S, hd)
        head_outs.append(oh)
    attn = jnp.concatenate(head_outs, axis=-1).reshape(BS, D)     # (BS, D) f32
    attn = jnp.dot(attn.astype(bf16), wo_ref[0],
                   preferred_element_type=f32) + bo_ref[0]

    # ---- residual + LayerNorm 1 (post-norm), f32 ----------------------------
    y = x + attn
    mu = jnp.mean(y, axis=-1, keepdims=True)
    var = jnp.mean((y - mu) ** 2, axis=-1, keepdims=True)
    y = (y - mu) * jax.lax.rsqrt(var + eps) * g1_ref[0] + beta1_ref[0]

    # ---- feed-forward (ReLU), bf16 matmuls + f32 accumulate ------------------
    h1 = jnp.dot(y.astype(bf16), w1_ref[0], preferred_element_type=f32) + b1_ref[0]
    h1 = jnp.maximum(h1, 0.0)
    h2 = jnp.dot(h1.astype(bf16), w2_ref[0], preferred_element_type=f32) + b2_ref[0]

    # ---- residual + LayerNorm 2, f32 ----------------------------------------
    z = y + h2
    mu2 = jnp.mean(z, axis=-1, keepdims=True)
    var2 = jnp.mean((z - mu2) ** 2, axis=-1, keepdims=True)
    z = (z - mu2) * jax.lax.rsqrt(var2 + eps) * g2_ref[0] + beta2_ref[0]

    # Keep the activation resident for the next layer.
    x_scr[...] = z

    # Only the last layer writes the output block back to HBM.
    @pl.when(l == pl.num_programs(1) - 1)
    def _():
        o_ref[...] = z.reshape(TB, S, D).astype(o_ref.dtype)


def sir_forward(M, layer_params, num_heads, *, batch_tile=None):
    """Full SelfAttentionTransformer.forward in one fused pallas_call.

    M: (batch, seq, input_dim). Returns (batch, seq, input_dim)."""
    B, S, D = M.shape
    L = len(layer_params)
    assert D % num_heads == 0, "input_dim must be divisible by num_heads"
    TB = B if batch_tile is None else batch_tile
    assert B % TB == 0
    Hff = layer_params[0]["w1_t"].shape[1]

    def stack(name):
        return jnp.stack([lp[name] for lp in layer_params], axis=0)

    # Matmul weights in bf16 (halves DMA + VMEM, f32 accumulation in-kernel);
    # biases / LayerNorm affine params stay f32.
    WIN = stack("win_t").astype(jnp.bfloat16)   # (L, D, 3D)
    WO = stack("wo_t").astype(jnp.bfloat16)     # (L, D, D)
    W1 = stack("w1_t").astype(jnp.bfloat16)     # (L, D, Hff)
    W2 = stack("w2_t").astype(jnp.bfloat16)     # (L, Hff, D)
    BIN = stack("bin")                          # (L, 1, 3D)
    BO = stack("bo")                            # (L, 1, D)
    B1 = stack("b1")                            # (L, 1, Hff)
    B2 = stack("b2")                            # (L, 1, D)
    G1 = stack("g1")
    BE1 = stack("beta1")
    G2 = stack("g2")
    BE2 = stack("beta2")

    def wspec(*tail):
        # Per-layer weight block, selected by the layer grid axis.
        return pl.BlockSpec((1,) + tuple(tail), lambda b, l: (l,) + (0,) * len(tail))

    x_spec = pl.BlockSpec((TB, S, D), lambda b, l: (b, 0, 0))
    out_spec = pl.BlockSpec((TB, S, D), lambda b, l: (b, 0, 0))

    in_specs = [
        x_spec,
        wspec(D, 3 * D), wspec(1, 3 * D),     # in-proj W^T, b
        wspec(D, D), wspec(1, D),             # out-proj W^T, b
        wspec(D, Hff), wspec(1, Hff),         # linear1 W^T, b
        wspec(Hff, D), wspec(1, D),           # linear2 W^T, b
        wspec(1, D), wspec(1, D),             # norm1 gamma, beta
        wspec(1, D), wspec(1, D),             # norm2 gamma, beta
    ]

    kernel = functools.partial(sir_fused_kernel, num_heads=num_heads)
    return pl.pallas_call(
        kernel,
        out_shape=jax.ShapeDtypeStruct((B, S, D), M.dtype),
        grid_spec=pltpu.PrefetchScalarGridSpec(
            num_scalar_prefetch=0,
            grid=(B // TB, L),                 # layer axis iterates fastest
            in_specs=in_specs,
            out_specs=out_spec,
            scratch_shapes=[pltpu.VMEM((TB * S, D), jnp.float32)],
        ),
        compiler_params=pltpu.CompilerParams(
            dimension_semantics=("parallel", "arbitrary"),
            vmem_limit_bytes=64 * 1024 * 1024),
    )(M, WIN, BIN, WO, BO, W1, B1, W2, B2, G1, BE1, G2, BE2)


def init_sir_params(key, input_dim, hidden_dim, num_layers):
    """Deterministic synthetic weights (shapes match nn.TransformerEncoderLayer).
    Linear weights are stored pre-transposed (in_features, out_features)."""
    layers = []
    for _ in range(num_layers):
        key, *ks = jax.random.split(key, 8)
        d, h = input_dim, hidden_dim
        sc = 0.05
        layers.append({
            "win_t": sc * jax.random.normal(ks[0], (d, 3 * d), jnp.float32),
            "bin":   sc * jax.random.normal(ks[1], (1, 3 * d), jnp.float32),
            "wo_t":  sc * jax.random.normal(ks[2], (d, d), jnp.float32),
            "bo":    sc * jax.random.normal(ks[3], (1, d), jnp.float32),
            "w1_t":  sc * jax.random.normal(ks[4], (d, h), jnp.float32),
            "b1":    sc * jax.random.normal(ks[5], (1, h), jnp.float32),
            "w2_t":  sc * jax.random.normal(ks[6], (h, d), jnp.float32),
            "b2":    jnp.zeros((1, d), jnp.float32),
            "g1":    jnp.ones((1, d), jnp.float32),
            "beta1": jnp.zeros((1, d), jnp.float32),
            "g2":    jnp.ones((1, d), jnp.float32),
            "beta2": jnp.zeros((1, d), jnp.float32),
        })
    return layers


def _layer_norm(x, g, b, eps=1e-5):
    mu = jnp.mean(x, axis=-1, keepdims=True)
    var = jnp.mean((x - mu) ** 2, axis=-1, keepdims=True)
    return (x - mu) * jax.lax.rsqrt(var + eps) * g + b


def sir_reference(M, layer_params, num_heads):
    """Pure-JAX f32 reference (eval-mode nn.TransformerEncoderLayer stack)."""
    B, S, D = M.shape
    H = num_heads
    hd = D // H
    x = M
    for lp in layer_params:
        qkv = x @ lp["win_t"] + lp["bin"][0]
        q, k, v = jnp.split(qkv, 3, axis=-1)
        qh = q.reshape(B, S, H, hd).transpose(0, 2, 1, 3)
        kh = k.reshape(B, S, H, hd).transpose(0, 2, 1, 3)
        vh = v.reshape(B, S, H, hd).transpose(0, 2, 1, 3)
        s = jnp.einsum('bhqd,bhkd->bhqk', qh, kh) / math.sqrt(hd)
        p = jax.nn.softmax(s, axis=-1)
        o = jnp.einsum('bhqk,bhkd->bhqd', p, vh)
        o = o.transpose(0, 2, 1, 3).reshape(B, S, D)
        o = o @ lp["wo_t"] + lp["bo"][0]
        y = _layer_norm(x + o, lp["g1"][0], lp["beta1"][0])
        h1 = jnp.maximum(y @ lp["w1_t"] + lp["b1"][0], 0.0)
        h2 = h1 @ lp["w2_t"] + lp["b2"][0]
        x = _layer_norm(y + h2, lp["g2"][0], lp["beta2"][0])
    return x


if __name__ == "__main__":
    # Small shapes consistent with the module: (batch, seq, input_dim)
    batch, seq, input_dim = 2, 8, 32
    hidden_dim, num_heads, num_layers = 64, 4, 2

    key = jax.random.PRNGKey(0)
    key, kx = jax.random.split(key)
    M = jax.random.normal(kx, (batch, seq, input_dim), jnp.float32)

    params = init_sir_params(key, input_dim, hidden_dim, num_layers)

    # One batch tile (fewer, bigger grid steps on v5e/v6e); on v7x choose
    # batch_tile so the parallel axis has >= 2 steps once batch is larger.
    out = sir_forward(M, params, num_heads, batch_tile=batch)
    out = jax.block_until_ready(out)
    assert out.shape == (batch, seq, input_dim)

    # Loose tolerance: kernel uses bf16 matmuls (f32 accumulate) + approx recip.
    ref = sir_reference(M, params, num_heads)
    assert jnp.allclose(out, ref, atol=5e-2, rtol=5e-2), float(
        jnp.max(jnp.abs(out - ref)))

    print("KERNEL_OK")
</pallas_src>

<mosaic_0001>
module attributes {stable_mosaic.version = 11 : i64} {
  func.func @sir_fused_kernel(%arg0: i32, %arg1: i32, %arg2: memref<2x8x32xf32, #tpu.memory_space<vmem>>, %arg3: memref<1x32x96xbf16, #tpu.memory_space<vmem>>, %arg4: memref<1x1x96xf32, #tpu.memory_space<vmem>>, %arg5: memref<1x32x32xbf16, #tpu.memory_space<vmem>>, %arg6: memref<1x1x32xf32, #tpu.memory_space<vmem>>, %arg7: memref<1x32x64xbf16, #tpu.memory_space<vmem>>, %arg8: memref<1x1x64xf32, #tpu.memory_space<vmem>>, %arg9: memref<1x64x32xbf16, #tpu.memory_space<vmem>>, %arg10: memref<1x1x32xf32, #tpu.memory_space<vmem>>, %arg11: memref<1x1x32xf32, #tpu.memory_space<vmem>>, %arg12: memref<1x1x32xf32, #tpu.memory_space<vmem>>, %arg13: memref<1x1x32xf32, #tpu.memory_space<vmem>>, %arg14: memref<1x1x32xf32, #tpu.memory_space<vmem>>, %arg15: memref<2x8x32xf32, #tpu.memory_space<vmem>>, %arg16: memref<16x32xf32, #tpu.memory_space<vmem>>) attributes {dimension_semantics = [#tpu.dimension_semantics<parallel>, #tpu.dimension_semantics<arbitrary>], iteration_bounds = array<i64: 1, 2>, scalar_prefetch = 0 : i64, scratch_operands = 1 : i64, tpu.core_type = #tpu.core_type<tc>, window_params = [{transform_indices = @transform_0, window_bounds = array<i64: 2, 8, 32>}, {transform_indices = @transform_1, window_bounds = array<i64: 1, 32, 96>}, {transform_indices = @transform_2, window_bounds = array<i64: 1, 1, 96>}, {transform_indices = @transform_3, window_bounds = array<i64: 1, 32, 32>}, {transform_indices = @transform_4, window_bounds = array<i64: 1, 1, 32>}, {transform_indices = @transform_5, window_bounds = array<i64: 1, 32, 64>}, {transform_indices = @transform_6, window_bounds = array<i64: 1, 1, 64>}, {transform_indices = @transform_7, window_bounds = array<i64: 1, 64, 32>}, {transform_indices = @transform_8, window_bounds = array<i64: 1, 1, 32>}, {transform_indices = @transform_9, window_bounds = array<i64: 1, 1, 32>}, {transform_indices = @transform_10, window_bounds = array<i64: 1, 1, 32>}, {transform_indices = @transform_11, window_bounds = array<i64: 1, 1, 32>}, {transform_indices = @transform_12, window_bounds = array<i64: 1, 1, 32>}, {transform_indices = @transform_13, window_bounds = array<i64: 2, 8, 32>}]} {
    %c0_i32 = arith.constant 0 : i32
    %0 = arith.cmpi eq, %arg1, %c0_i32 : i32
    %1 = arith.extui %0 : i1 to i32
    %c0_i32_0 = arith.constant 0 : i32
    %2 = arith.cmpi ne, %1, %c0_i32_0 : i32
    scf.if %2 {
      %c0_75 = arith.constant 0 : index
      %c0_76 = arith.constant 0 : index
      %c0_77 = arith.constant 0 : index
      %188 = vector.load %arg2[%c0_75, %c0_76, %c0_77] : memref<2x8x32xf32, #tpu.memory_space<vmem>>, vector<2x8x32xf32>
      %189 = vector.shape_cast %188 : vector<2x8x32xf32> to vector<16x32xf32>
      %c0_78 = arith.constant 0 : index
      %c0_79 = arith.constant 0 : index
      %190 = vector.load %arg16[%c0_78, %c0_79] : memref<16x32xf32, #tpu.memory_space<vmem>>, vector<16x32xf32>
      tpu.vector_store %arg16[%c0_78, %c0_79], %189 {strides = array<i32>} : memref<16x32xf32, #tpu.memory_space<vmem>>, vector<16x32xf32>,
    } else {
    }
    %c0 = arith.constant 0 : index
    %c0_1 = arith.constant 0 : index
    %3 = vector.load %arg16[%c0, %c0_1] : memref<16x32xf32, #tpu.memory_space<vmem>>, vector<16x32xf32>
    %4 = arith.truncf %3 : vector<16x32xf32> to vector<16x32xbf16>
    %c0_2 = arith.constant 0 : index
    %c0_3 = arith.constant 0 : index
    %c0_4 = arith.constant 0 : index
    %5 = vector.load %arg3[%c0_2, %c0_3, %c0_4] : memref<1x32x96xbf16, #tpu.memory_space<vmem>>, vector<1x32x96xbf16>
    %6 = vector.shape_cast %5 : vector<1x32x96xbf16> to vector<32x96xbf16>
    %cst = arith.constant dense<0.000000e+00> : vector<16x96xf32>
    %7 = tpu.matmul %4, %6, %cst {dimension_numbers = #tpu.dot_dimension_numbers<[1], [0], [0], [1], [0, 0, 1, 1], [], []>} : vector<16x32xbf16>, vector<32x96xbf16>, vector<16x96xf32> -> vector<16x96xf32>
    %c0_5 = arith.constant 0 : index
    %c0_6 = arith.constant 0 : index
    %c0_7 = arith.constant 0 : index
    %8 = vector.load %arg4[%c0_5, %c0_6, %c0_7] : memref<1x1x96xf32, #tpu.memory_space<vmem>>, vector<1x1x96xf32>
    %9 = vector.shape_cast %8 : vector<1x1x96xf32> to vector<1x96xf32>
    %10 = vector.broadcast %9 : vector<1x96xf32> to vector<16x96xf32>
    %11 = arith.addf %7, %10 : vector<16x96xf32>
    %12 = vector.extract_strided_slice %11 {offsets = [0, 0], sizes = [16, 32], strides = [1, 1]} : vector<16x96xf32> to vector<16x32xf32>
    %13 = vector.shape_cast %12 : vector<16x32xf32> to vector<2x8x32xf32>
    %14 = vector.extract_strided_slice %11 {offsets = [0, 32], sizes = [16, 32], strides = [1, 1]} : vector<16x96xf32> to vector<16x32xf32>
    %15 = vector.shape_cast %14 : vector<16x32xf32> to vector<2x8x32xf32>
    %16 = vector.extract_strided_slice %11 {offsets = [0, 64], sizes = [16, 32], strides = [1, 1]} : vector<16x96xf32> to vector<16x32xf32>
    %17 = vector.shape_cast %16 : vector<16x32xf32> to vector<2x8x32xf32>
    %18 = vector.extract_strided_slice %13 {offsets = [0, 0, 0], sizes = [2, 8, 8], strides = [1, 1, 1]} : vector<2x8x32xf32> to vector<2x8x8xf32>
    %19 = arith.truncf %18 : vector<2x8x8xf32> to vector<2x8x8xbf16>
    %20 = vector.extract_strided_slice %15 {offsets = [0, 0, 0], sizes = [2, 8, 8], strides = [1, 1, 1]} : vector<2x8x32xf32> to vector<2x8x8xf32>
    %21 = arith.truncf %20 : vector<2x8x8xf32> to vector<2x8x8xbf16>
    %22 = vector.extract_strided_slice %17 {offsets = [0, 0, 0], sizes = [2, 8, 8], strides = [1, 1, 1]} : vector<2x8x32xf32> to vector<2x8x8xf32>
    %23 = arith.truncf %22 : vector<2x8x8xf32> to vector<2x8x8xbf16>
    "tpu.trace_start"() <{level = 10 : i32, message = "bqd,bkd->bqk"}> : () -> ()
    %cst_8 = arith.constant dense<0.000000e+00> : vector<2x8x8xf32>
    %24 = tpu.matmul %19, %21, %cst_8 {dimension_numbers = #tpu.dot_dimension_numbers<[2], [2], [1], [1], [0, 0, 0, 1, 1, 1], [0], [0]>} : vector<2x8x8xbf16>, vector<2x8x8xbf16>, vector<2x8x8xf32> -> vector<2x8x8xf32>
    "tpu.trace_stop"() : () -> ()
    %cst_9 = arith.constant 0.353553385 : f32
    %25 = vector.broadcast %cst_9 : f32 to vector<2x8x8xf32>
    %26 = arith.mulf %24, %25 : vector<2x8x8xf32>
    %cst_10 = arith.constant dense<0xFF800000> : vector<2x8xf32>
    %27 = vector.multi_reduction <maximumf>, %26, %cst_10 [2] : vector<2x8x8xf32> to vector<2x8xf32>
    %28 = vector.shape_cast %27 : vector<2x8xf32> to vector<2x8x1xf32>
    %29 = vector.broadcast %28 : vector<2x8x1xf32> to vector<2x8x8xf32>
    %30 = arith.subf %26, %29 : vector<2x8x8xf32>
    %31 = math.exp %30 : vector<2x8x8xf32>
    %cst_11 = arith.constant dense<0.000000e+00> : vector<2x8xf32>
    %32 = vector.multi_reduction <add>, %31, %cst_11 [2] : vector<2x8x8xf32> to vector<2x8xf32>
    %33 = vector.shape_cast %32 : vector<2x8xf32> to vector<2x8x1xf32>
    %34 = tpu.reciprocal %33 {approx = true} : vector<2x8x1xf32> -> vector<2x8x1xf32>
    %35 = vector.broadcast %34 : vector<2x8x1xf32> to vector<2x8x8xf32>
    %36 = arith.mulf %31, %35 : vector<2x8x8xf32>
    %37 = arith.truncf %36 : vector<2x8x8xf32> to vector<2x8x8xbf16>
    "tpu.trace_start"() <{level = 10 : i32, message = "bqk,bkd->bqd"}> : () -> ()
    %cst_12 = arith.constant dense<0.000000e+00> : vector<2x8x8xf32>
    %38 = tpu.matmul %37, %23, %cst_12 {dimension_numbers = #tpu.dot_dimension_numbers<[2], [1], [1], [2], [0, 0, 0, 1, 1, 2], [0], [0]>} : vector<2x8x8xbf16>, vector<2x8x8xbf16>, vector<2x8x8xf32> -> vector<2x8x8xf32>
    "tpu.trace_stop"() : () -> ()
    %39 = vector.extract_strided_slice %13 {offsets = [0, 0, 8], sizes = [2, 8, 8], strides = [1, 1, 1]} : vector<2x8x32xf32> to vector<2x8x8xf32>
    %40 = arith.truncf %39 : vector<2x8x8xf32> to vector<2x8x8xbf16>
    %41 = vector.extract_strided_slice %15 {offsets = [0, 0, 8], sizes = [2, 8, 8], strides = [1, 1, 1]} : vector<2x8x32xf32> to vector<2x8x8xf32>
    %42 = arith.truncf %41 : vector<2x8x8xf32> to vector<2x8x8xbf16>
    %43 = vector.extract_strided_slice %17 {offsets = [0, 0, 8], sizes = [2, 8, 8], strides = [1, 1, 1]} : vector<2x8x32xf32> to vector<2x8x8xf32>
    %44 = arith.truncf %43 : vector<2x8x8xf32> to vector<2x8x8xbf16>
    "tpu.trace_start"() <{level = 10 : i32, message = "bqd,bkd->bqk"}> : () -> ()
    %cst_13 = arith.constant dense<0.000000e+00> : vector<2x8x8xf32>
    %45 = tpu.matmul %40, %42, %cst_13 {dimension_numbers = #tpu.dot_dimension_numbers<[2], [2], [1], [1], [0, 0, 0, 1, 1, 1], [0], [0]>} : vector<2x8x8xbf16>, vector<2x8x8xbf16>, vector<2x8x8xf32> -> vector<2x8x8xf32>
    "tpu.trace_stop"() : () -> ()
    %cst_14 = arith.constant 0.353553385 : f32
    %46 = vector.broadcast %cst_14 : f32 to vector<2x8x8xf32>
    %47 = arith.mulf %45, %46 : vector<2x8x8xf32>
    %cst_15 = arith.constant dense<0xFF800000> : vector<2x8xf32>
    %48 = vector.multi_reduction <maximumf>, %47, %cst_15 [2] : vector<2x8x8xf32> to vector<2x8xf32>
    %49 = vector.shape_cast %48 : vector<2x8xf32> to vector<2x8x1xf32>
    %50 = vector.broadcast %49 : vector<2x8x1xf32> to vector<2x8x8xf32>
    %51 = arith.subf %47, %50 : vector<2x8x8xf32>
    %52 = math.exp %51 : vector<2x8x8xf32>
    %cst_16 = arith.constant dense<0.000000e+00> : vector<2x8xf32>
    %53 = vector.multi_reduction <add>, %52, %cst_16 [2] : vector<2x8x8xf32> to vector<2x8xf32>
    %54 = vector.shape_cast %53 : vector<2x8xf32> to vector<2x8x1xf32>
    %55 = tpu.reciprocal %54 {approx = true} : vector<2x8x1xf32> -> vector<2x8x1xf32>
    %56 = vector.broadcast %55 : vector<2x8x1xf32> to vector<2x8x8xf32>
    %57 = arith.mulf %52, %56 : vector<2x8x8xf32>
    %58 = arith.truncf %57 : vector<2x8x8xf32> to vector<2x8x8xbf16>
    "tpu.trace_start"() <{level = 10 : i32, message = "bqk,bkd->bqd"}> : () -> ()
    %cst_17 = arith.constant dense<0.000000e+00> : vector<2x8x8xf32>
    %59 = tpu.matmul %58, %44, %cst_17 {dimension_numbers = #tpu.dot_dimension_numbers<[2], [1], [1], [2], [0, 0, 0, 1, 1, 2], [0], [0]>} : vector<2x8x8xbf16>, vector<2x8x8xbf16>, vector<2x8x8xf32> -> vector<2x8x8xf32>
    "tpu.trace_stop"() : () -> ()
    %60 = vector.extract_strided_slice %13 {offsets = [0, 0, 16], sizes = [2, 8, 8], strides = [1, 1, 1]} : vector<2x8x32xf32> to vector<2x8x8xf32>
    %61 = arith.truncf %60 : vector<2x8x8xf32> to vector<2x8x8xbf16>
    %62 = vector.extract_strided_slice %15 {offsets = [0, 0, 16], sizes = [2, 8, 8], strides = [1, 1, 1]} : vector<2x8x32xf32> to vector<2x8x8xf32>
    %63 = arith.truncf %62 : vector<2x8x8xf32> to vector<2x8x8xbf16>
    %64 = vector.extract_strided_slice %17 {offsets = [0, 0, 16], sizes = [2, 8, 8], strides = [1, 1, 1]} : vector<2x8x32xf32> to vector<2x8x8xf32>
    %65 = arith.truncf %64 : vector<2x8x8xf32> to vector<2x8x8xbf16>
    "tpu.trace_start"() <{level = 10 : i32, message = "bqd,bkd->bqk"}> : () -> ()
    %cst_18 = arith.constant dense<0.000000e+00> : vector<2x8x8xf32>
    %66 = tpu.matmul %61, %63, %cst_18 {dimension_numbers = #tpu.dot_dimension_numbers<[2], [2], [1], [1], [0, 0, 0, 1, 1, 1], [0], [0]>} : vector<2x8x8xbf16>, vector<2x8x8xbf16>, vector<2x8x8xf32> -> vector<2x8x8xf32>
    "tpu.trace_stop"() : () -> ()
    %cst_19 = arith.constant 0.353553385 : f32
    %67 = vector.broadcast %cst_19 : f32 to vector<2x8x8xf32>
    %68 = arith.mulf %66, %67 : vector<2x8x8xf32>
    %cst_20 = arith.constant dense<0xFF800000> : vector<2x8xf32>
    %69 = vector.multi_reduction <maximumf>, %68, %cst_20 [2] : vector<2x8x8xf32> to vector<2x8xf32>
    %70 = vector.shape_cast %69 : vector<2x8xf32> to vector<2x8x1xf32>
    %71 = vector.broadcast %70 : vector<2x8x1xf32> to vector<2x8x8xf32>
    %72 = arith.subf %68, %71 : vector<2x8x8xf32>
    %73 = math.exp %72 : vector<2x8x8xf32>
    %cst_21 = arith.constant dense<0.000000e+00> : vector<2x8xf32>
    %74 = vector.multi_reduction <add>, %73, %cst_21 [2] : vector<2x8x8xf32> to vector<2x8xf32>
    %75 = vector.shape_cast %74 : vector<2x8xf32> to vector<2x8x1xf32>
    %76 = tpu.reciprocal %75 {approx = true} : vector<2x8x1xf32> -> vector<2x8x1xf32>
    %77 = vector.broadcast %76 : vector<2x8x1xf32> to vector<2x8x8xf32>
    %78 = arith.mulf %73, %77 : vector<2x8x8xf32>
    %79 = arith.truncf %78 : vector<2x8x8xf32> to vector<2x8x8xbf16>
    "tpu.trace_start"() <{level = 10 : i32, message = "bqk,bkd->bqd"}> : () -> ()
    %cst_22 = arith.constant dense<0.000000e+00> : vector<2x8x8xf32>
    %80 = tpu.matmul %79, %65, %cst_22 {dimension_numbers = #tpu.dot_dimension_numbers<[2], [1], [1], [2], [0, 0, 0, 1, 1, 2], [0], [0]>} : vector<2x8x8xbf16>, vector<2x8x8xbf16>, vector<2x8x8xf32> -> vector<2x8x8xf32>
    "tpu.trace_stop"() : () -> ()
    %81 = vector.extract_strided_slice %13 {offsets = [0, 0, 24], sizes = [2, 8, 8], strides = [1, 1, 1]} : vector<2x8x32xf32> to vector<2x8x8xf32>
    %82 = arith.truncf %81 : vector<2x8x8xf32> to vector<2x8x8xbf16>
    %83 = vector.extract_strided_slice %15 {offsets = [0, 0, 24], sizes = [2, 8, 8], strides = [1, 1, 1]} : vector<2x8x32xf32> to vector<2x8x8xf32>
    %84 = arith.truncf %83 : vector<2x8x8xf32> to vector<2x8x8xbf16>
    %85 = vector.extract_strided_slice %17 {offsets = [0, 0, 24], sizes = [2, 8, 8], strides = [1, 1, 1]} : vector<2x8x32xf32> to vector<2x8x8xf32>
    %86 = arith.truncf %85 : vector<2x8x8xf32> to vector<2x8x8xbf16>
    "tpu.trace_start"() <{level = 10 : i32, message = "bqd,bkd->bqk"}> : () -> ()
    %cst_23 = arith.constant dense<0.000000e+00> : vector<2x8x8xf32>
    %87 = tpu.matmul %82, %84, %cst_23 {dimension_numbers = #tpu.dot_dimension_numbers<[2], [2], [1], [1], [0, 0, 0, 1, 1, 1], [0], [0]>} : vector<2x8x8xbf16>, vector<2x8x8xbf16>, vector<2x8x8xf32> -> vector<2x8x8xf32>
    "tpu.trace_stop"() : () -> ()
    %cst_24 = arith.constant 0.353553385 : f32
    %88 = vector.broadcast %cst_24 : f32 to vector<2x8x8xf32>
    %89 = arith.mulf %87, %88 : vector<2x8x8xf32>
    %cst_25 = arith.constant dense<0xFF800000> : vector<2x8xf32>
    %90 = vector.multi_reduction <maximumf>, %89, %cst_25 [2] : vector<2x8x8xf32> to vector<2x8xf32>
    %91 = vector.shape_cast %90 : vector<2x8xf32> to vector<2x8x1xf32>
    %92 = vector.broadcast %91 : vector<2x8x1xf32> to vector<2x8x8xf32>
    %93 = arith.subf %89, %92 : vector<2x8x8xf32>
    %94 = math.exp %93 : vector<2x8x8xf32>
    %cst_26 = arith.constant dense<0.000000e+00> : vector<2x8xf32>
    %95 = vector.multi_reduction <add>, %94, %cst_26 [2] : vector<2x8x8xf32> to vector<2x8xf32>
    %96 = vector.shape_cast %95 : vector<2x8xf32> to vector<2x8x1xf32>
    %97 = tpu.reciprocal %96 {approx = true} : vector<2x8x1xf32> -> vector<2x8x1xf32>
    %98 = vector.broadcast %97 : vector<2x8x1xf32> to vector<2x8x8xf32>
    %99 = arith.mulf %94, %98 : vector<2x8x8xf32>
    %100 = arith.truncf %99 : vector<2x8x8xf32> to vector<2x8x8xbf16>
    "tpu.trace_start"() <{level = 10 : i32, message = "bqk,bkd->bqd"}> : () -> ()
    %cst_27 = arith.constant dense<0.000000e+00> : vector<2x8x8xf32>
    %101 = tpu.matmul %100, %86, %cst_27 {dimension_numbers = #tpu.dot_dimension_numbers<[2], [1], [1], [2], [0, 0, 0, 1, 1, 2], [0], [0]>} : vector<2x8x8xbf16>, vector<2x8x8xbf16>, vector<2x8x8xf32> -> vector<2x8x8xf32>
    "tpu.trace_stop"() : () -> ()
    %102 = tpu.concatenate %38, %59, %80, %101 in 2 : vector<2x8x8xf32>, vector<2x8x8xf32>, vector<2x8x8xf32>, vector<2x8x8xf32> -> vector<2x8x32xf32>
    %103 = vector.shape_cast %102 : vector<2x8x32xf32> to vector<16x32xf32>
    %104 = arith.truncf %103 : vector<16x32xf32> to vector<16x32xbf16>
    %c0_28 = arith.constant 0 : index
    %c0_29 = arith.constant 0 : index
    %c0_30 = arith.constant 0 : index
    %105 = vector.load %arg5[%c0_28, %c0_29, %c0_30] : memref<1x32x32xbf16, #tpu.memory_space<vmem>>, vector<1x32x32xbf16>
    %106 = vector.shape_cast %105 : vector<1x32x32xbf16> to vector<32x32xbf16>
    %cst_31 = arith.constant dense<0.000000e+00> : vector<16x32xf32>
    %107 = tpu.matmul %104, %106, %cst_31 {dimension_numbers = #tpu.dot_dimension_numbers<[1], [0], [0], [1], [0, 0, 1, 1], [], []>} : vector<16x32xbf16>, vector<32x32xbf16>, vector<16x32xf32> -> vector<16x32xf32>
    %c0_32 = arith.constant 0 : index
    %c0_33 = arith.constant 0 : index
    %c0_34 = arith.constant 0 : index
    %108 = vector.load %arg6[%c0_32, %c0_33, %c0_34] : memref<1x1x32xf32, #tpu.memory_space<vmem>>, vector<1x1x32xf32>
    %109 = vector.shape_cast %108 : vector<1x1x32xf32> to vector<1x32xf32>
    %110 = vector.broadcast %109 : vector<1x32xf32> to vector<16x32xf32>
    %111 = arith.addf %107, %110 : vector<16x32xf32>
    %112 = arith.addf %3, %111 : vector<16x32xf32>
    %cst_35 = arith.constant dense<0.000000e+00> : vector<16xf32>
    %113 = vector.multi_reduction <add>, %112, %cst_35 [1] : vector<16x32xf32> to vector<16xf32>
    %114 = vector.shape_cast %113 : vector<16xf32> to vector<16x1xf32>
    %cst_36 = arith.constant 3.200000e+01 : f32
    %115 = vector.broadcast %cst_36 : f32 to vector<16x1xf32>
    %116 = arith.divf %114, %115 : vector<16x1xf32>
    %117 = vector.broadcast %116 : vector<16x1xf32> to vector<16x32xf32>
    %118 = arith.subf %112, %117 : vector<16x32xf32>
    %119 = arith.mulf %118, %118 : vector<16x32xf32>
    %cst_37 = arith.constant dense<0.000000e+00> : vector<16xf32>
    %120 = vector.multi_reduction <add>, %119, %cst_37 [1] : vector<16x32xf32> to vector<16xf32>
    %121 = vector.shape_cast %120 : vector<16xf32> to vector<16x1xf32>
    %cst_38 = arith.constant 3.200000e+01 : f32
    %122 = vector.broadcast %cst_38 : f32 to vector<16x1xf32>
    %123 = arith.divf %121, %122 : vector<16x1xf32>
    %124 = vector.broadcast %116 : vector<16x1xf32> to vector<16x32xf32>
    %125 = arith.subf %112, %124 : vector<16x32xf32>
    %cst_39 = arith.constant 9.99999974E-6 : f32
    %126 = vector.broadcast %cst_39 : f32 to vector<16x1xf32>
    %127 = arith.addf %123, %126 : vector<16x1xf32>
    %128 = math.rsqrt %127 : vector<16x1xf32>
    %129 = vector.broadcast %128 : vector<16x1xf32> to vector<16x32xf32>
    %130 = arith.mulf %125, %129 : vector<16x32xf32>
    %c0_40 = arith.constant 0 : index
    %c0_41 = arith.constant 0 : index
    %c0_42 = arith.constant 0 : index
    %131 = vector.load %arg11[%c0_40, %c0_41, %c0_42] : memref<1x1x32xf32, #tpu.memory_space<vmem>>, vector<1x1x32xf32>
    %132 = vector.shape_cast %131 : vector<1x1x32xf32> to vector<1x32xf32>
    %133 = vector.broadcast %132 : vector<1x32xf32> to vector<16x32xf32>
    %134 = arith.mulf %130, %133 : vector<16x32xf32>
    %c0_43 = arith.constant 0 : index
    %c0_44 = arith.constant 0 : index
    %c0_45 = arith.constant 0 : index
    %135 = vector.load %arg12[%c0_43, %c0_44, %c0_45] : memref<1x1x32xf32, #tpu.memory_space<vmem>>, vector<1x1x32xf32>
    %136 = vector.shape_cast %135 : vector<1x1x32xf32> to vector<1x32xf32>
    %137 = vector.broadcast %136 : vector<1x32xf32> to vector<16x32xf32>
    %138 = arith.addf %134, %137 : vector<16x32xf32>
    %139 = arith.truncf %138 : vector<16x32xf32> to vector<16x32xbf16>
    %c0_46 = arith.constant 0 : index
    %c0_47 = arith.constant 0 : index
    %c0_48 = arith.constant 0 : index
    %140 = vector.load %arg7[%c0_46, %c0_47, %c0_48] : memref<1x32x64xbf16, #tpu.memory_space<vmem>>, vector<1x32x64xbf16>
    %141 = vector.shape_cast %140 : vector<1x32x64xbf16> to vector<32x64xbf16>
    %cst_49 = arith.constant dense<0.000000e+00> : vector<16x64xf32>
    %142 = tpu.matmul %139, %141, %cst_49 {dimension_numbers = #tpu.dot_dimension_numbers<[1], [0], [0], [1], [0, 0, 1, 1], [], []>} : vector<16x32xbf16>, vector<32x64xbf16>, vector<16x64xf32> -> vector<16x64xf32>
    %c0_50 = arith.constant 0 : index
    %c0_51 = arith.constant 0 : index
    %c0_52 = arith.constant 0 : index
    %143 = vector.load %arg8[%c0_50, %c0_51, %c0_52] : memref<1x1x64xf32, #tpu.memory_space<vmem>>, vector<1x1x64xf32>
    %144 = vector.shape_cast %143 : vector<1x1x64xf32> to vector<1x64xf32>
    %145 = vector.broadcast %144 : vector<1x64xf32> to vector<16x64xf32>
    %146 = arith.addf %142, %145 : vector<16x64xf32>
    %cst_53 = arith.constant 0.000000e+00 : f32
    %147 = vector.broadcast %cst_53 : f32 to vector<16x64xf32>
    %148 = arith.maximumf %146, %147 : vector<16x64xf32>
    %149 = arith.truncf %148 : vector<16x64xf32> to vector<16x64xbf16>
    %c0_54 = arith.constant 0 : index
    %c0_55 = arith.constant 0 : index
    %c0_56 = arith.constant 0 : index
    %150 = vector.load %arg9[%c0_54, %c0_55, %c0_56] : memref<1x64x32xbf16, #tpu.memory_space<vmem>>, vector<1x64x32xbf16>
    %151 = vector.shape_cast %150 : vector<1x64x32xbf16> to vector<64x32xbf16>
    %cst_57 = arith.constant dense<0.000000e+00> : vector<16x32xf32>
    %152 = tpu.matmul %149, %151, %cst_57 {dimension_numbers = #tpu.dot_dimension_numbers<[1], [0], [0], [1], [0, 0, 1, 1], [], []>} : vector<16x64xbf16>, vector<64x32xbf16>, vector<16x32xf32> -> vector<16x32xf32>
    %c0_58 = arith.constant 0 : index
    %c0_59 = arith.constant 0 : index
    %c0_60 = arith.constant 0 : index
    %153 = vector.load %arg10[%c0_58, %c0_59, %c0_60] : memref<1x1x32xf32, #tpu.memory_space<vmem>>, vector<1x1x32xf32>
    %154 = vector.shape_cast %153 : vector<1x1x32xf32> to vector<1x32xf32>
    %155 = vector.broadcast %154 : vector<1x32xf32> to vector<16x32xf32>
    %156 = arith.addf %152, %155 : vector<16x32xf32>
    %157 = arith.addf %138, %156 : vector<16x32xf32>
    %cst_61 = arith.constant dense<0.000000e+00> : vector<16xf32>
    %158 = vector.multi_reduction <add>, %157, %cst_61 [1] : vector<16x32xf32> to vector<16xf32>
    %159 = vector.shape_cast %158 : vector<16xf32> to vector<16x1xf32>
    %cst_62 = arith.constant 3.200000e+01 : f32
    %160 = vector.broadcast %cst_62 : f32 to vector<16x1xf32>
    %161 = arith.divf %159, %160 : vector<16x1xf32>
    %162 = vector.broadcast %161 : vector<16x1xf32> to vector<16x32xf32>
    %163 = arith.subf %157, %162 : vector<16x32xf32>
    %164 = arith.mulf %163, %163 : vector<16x32xf32>
    %cst_63 = arith.constant dense<0.000000e+00> : vector<16xf32>
    %165 = vector.multi_reduction <add>, %164, %cst_63 [1] : vector<16x32xf32> to vector<16xf32>
    %166 = vector.shape_cast %165 : vector<16xf32> to vector<16x1xf32>
    %cst_64 = arith.constant 3.200000e+01 : f32
    %167 = vector.broadcast %cst_64 : f32 to vector<16x1xf32>
    %168 = arith.divf %166, %167 : vector<16x1xf32>
    %169 = vector.broadcast %161 : vector<16x1xf32> to vector<16x32xf32>
    %170 = arith.subf %157, %169 : vector<16x32xf32>
    %cst_65 = arith.constant 9.99999974E-6 : f32
    %171 = vector.broadcast %cst_65 : f32 to vector<16x1xf32>
    %172 = arith.addf %168, %171 : vector<16x1xf32>
    %173 = math.rsqrt %172 : vector<16x1xf32>
    %174 = vector.broadcast %173 : vector<16x1xf32> to vector<16x32xf32>
    %175 = arith.mulf %170, %174 : vector<16x32xf32>
    %c0_66 = arith.constant 0 : index
    %c0_67 = arith.constant 0 : index
    %c0_68 = arith.constant 0 : index
    %176 = vector.load %arg13[%c0_66, %c0_67, %c0_68] : memref<1x1x32xf32, #tpu.memory_space<vmem>>, vector<1x1x32xf32>
    %177 = vector.shape_cast %176 : vector<1x1x32xf32> to vector<1x32xf32>
    %178 = vector.broadcast %177 : vector<1x32xf32> to vector<16x32xf32>
    %179 = arith.mulf %175, %178 : vector<16x32xf32>
    %c0_69 = arith.constant 0 : index
    %c0_70 = arith.constant 0 : index
    %c0_71 = arith.constant 0 : index
    %180 = vector.load %arg14[%c0_69, %c0_70, %c0_71] : memref<1x1x32xf32, #tpu.memory_space<vmem>>, vector<1x1x32xf32>
    %181 = vector.shape_cast %180 : vector<1x1x32xf32> to vector<1x32xf32>
    %182 = vector.broadcast %181 : vector<1x32xf32> to vector<16x32xf32>
    %183 = arith.addf %179, %182 : vector<16x32xf32>
    %c0_72 = arith.constant 0 : index
    %c0_73 = arith.constant 0 : index
    %184 = vector.load %arg16[%c0_72, %c0_73] : memref<16x32xf32, #tpu.memory_space<vmem>>, vector<16x32xf32>
    tpu.vector_store %arg16[%c0_72, %c0_73], %183 {strides = array<i32>} : memref<16x32xf32, #tpu.memory_space<vmem>>, vector<16x32xf32>,
    %c1_i32 = arith.constant 1 : i32
    %185 = arith.cmpi eq, %arg1, %c1_i32 : i32
    %186 = arith.extui %185 : i1 to i32
    %c0_i32_74 = arith.constant 0 : i32
    %187 = arith.cmpi ne, %186, %c0_i32_74 : i32
    scf.if %187 {
      %188 = vector.shape_cast %183 : vector<16x32xf32> to vector<2x8x32xf32>
      %c0_75 = arith.constant 0 : index
      %c0_76 = arith.constant 0 : index
      %c0_77 = arith.constant 0 : index
      %189 = vector.load %arg15[%c0_75, %c0_76, %c0_77] : memref<2x8x32xf32, #tpu.memory_space<vmem>>, vector<2x8x32xf32>
      tpu.vector_store %arg15[%c0_75, %c0_76, %c0_77], %188 {strides = array<i32>} : memref<2x8x32xf32, #tpu.memory_space<vmem>>, vector<2x8x32xf32>,
    } else {
    }
    return
  }
  func.func @transform_0(%arg0: i32, %arg1: i32) -> (i32, i32, i32) {
    %c0_i32 = arith.constant 0 : i32
    %c0_i32_0 = arith.constant 0 : i32
    %c0_i32_1 = arith.constant 0 : i32
    return %arg0, %c0_i32, %c0_i32_0 : i32, i32, i32
  }
  func.func @transform_1(%arg0: i32, %arg1: i32) -> (i32, i32, i32) {
    %c0_i32 = arith.constant 0 : i32
    %c0_i32_0 = arith.constant 0 : i32
    %c0_i32_1 = arith.constant 0 : i32
    return %arg1, %c0_i32, %c0_i32_0 : i32, i32, i32
  }
  func.func @transform_2(%arg0: i32, %arg1: i32) -> (i32, i32, i32) {
    %c0_i32 = arith.constant 0 : i32
    %c0_i32_0 = arith.constant 0 : i32
    %c0_i32_1 = arith.constant 0 : i32
    return %arg1, %c0_i32, %c0_i32_0 : i32, i32, i32
  }
  func.func @transform_3(%arg0: i32, %arg1: i32) -> (i32, i32, i32) {
    %c0_i32 = arith.constant 0 : i32
    %c0_i32_0 = arith.constant 0 : i32
    %c0_i32_1 = arith.constant 0 : i32
    return %arg1, %c0_i32, %c0_i32_0 : i32, i32, i32
  }
  func.func @transform_4(%arg0: i32, %arg1: i32) -> (i32, i32, i32) {
    %c0_i32 = arith.constant 0 : i32
    %c0_i32_0 = arith.constant 0 : i32
    %c0_i32_1 = arith.constant 0 : i32
    return %arg1, %c0_i32, %c0_i32_0 : i32, i32, i32
  }
  func.func @transform_5(%arg0: i32, %arg1: i32) -> (i32, i32, i32) {
    %c0_i32 = arith.constant 0 : i32
    %c0_i32_0 = arith.constant 0 : i32
    %c0_i32_1 = arith.constant 0 : i32
    return %arg1, %c0_i32, %c0_i32_0 : i32, i32, i32
  }
  func.func @transform_6(%arg0: i32, %arg1: i32) -> (i32, i32, i32) {
    %c0_i32 = arith.constant 0 : i32
    %c0_i32_0 = arith.constant 0 : i32
    %c0_i32_1 = arith.constant 0 : i32
    return %arg1, %c0_i32, %c0_i32_0 : i32, i32, i32
  }
  func.func @transform_7(%arg0: i32, %arg1: i32) -> (i32, i32, i32) {
    %c0_i32 = arith.constant 0 : i32
    %c0_i32_0 = arith.constant 0 : i32
    %c0_i32_1 = arith.constant 0 : i32
    return %arg1, %c0_i32, %c0_i32_0 : i32, i32, i32
  }
  func.func @transform_8(%arg0: i32, %arg1: i32) -> (i32, i32, i32) {
    %c0_i32 = arith.constant 0 : i32
    %c0_i32_0 = arith.constant 0 : i32
    %c0_i32_1 = arith.constant 0 : i32
    return %arg1, %c0_i32, %c0_i32_0 : i32, i32, i32
  }
  func.func @transform_9(%arg0: i32, %arg1: i32) -> (i32, i32, i32) {
    %c0_i32 = arith.constant 0 : i32
    %c0_i32_0 = arith.constant 0 : i32
    %c0_i32_1 = arith.constant 0 : i32
    return %arg1, %c0_i32, %c0_i32_0 : i32, i32, i32
  }
  func.func @transform_10(%arg0: i32, %arg1: i32) -> (i32, i32, i32) {
    %c0_i32 = arith.constant 0 : i32
    %c0_i32_0 = arith.constant 0 : i32
    %c0_i32_1 = arith.constant 0 : i32
    return %arg1, %c0_i32, %c0_i32_0 : i32, i32, i32
  }
  func.func @transform_11(%arg0: i32, %arg1: i32) -> (i32, i32, i32) {
    %c0_i32 = arith.constant 0 : i32
    %c0_i32_0 = arith.constant 0 : i32
    %c0_i32_1 = arith.constant 0 : i32
    return %arg1, %c0_i32, %c0_i32_0 : i32, i32, i32
  }
  func.func @transform_12(%arg0: i32, %arg1: i32) -> (i32, i32, i32) {
    %c0_i32 = arith.constant 0 : i32
    %c0_i32_0 = arith.constant 0 : i32
    %c0_i32_1 = arith.constant 0 : i32
    return %arg1, %c0_i32, %c0_i32_0 : i32, i32, i32
  }
  func.func @transform_13(%arg0: i32, %arg1: i32) -> (i32, i32, i32) {
    %c0_i32 = arith.constant 0 : i32
    %c0_i32_0 = arith.constant 0 : i32
    %c0_i32_1 = arith.constant 0 : i32
    return %arg0, %c0_i32, %c0_i32_0 : i32, i32, i32
  }
}

</mosaic_0001>

<bundles_post_ra>
// kernel: tpu_custom_call.1
= control target key start
LH: loop header
LB: loop body
LE: loop exit
PB: predicated region body
PF: predicated region fallthrough
CT: control target
= control target key end

     0   :  { %s4345_s0 = inlined_call_operand.hbm [shape: f32[2,8,32], index: 0, kind: input, shape index: {}]   ;;  %s4346_s1 = inlined_call_operand.hbm [shape: bf16[2,32,96], index: 1, kind: input, shape index: {}]   ;;  %s4347_s2 = inlined_call_operand.hbm [shape: f32[2,1,96], index: 2, kind: input, shape index: {}]   ;;  %s4348_s3 = inlined_call_operand.hbm [shape: bf16[2,32,32], index: 3, kind: input, shape index: {}]   ;;  %s4349_s4 = inlined_call_operand.hbm [shape: f32[2,1,32], index: 4, kind: input, shape index: {}]   ;;  %s4350_s5 = inlined_call_operand.hbm [shape: bf16[2,32,64], index: 5, kind: input, shape index: {}]   ;;  %s4351_s6 = inlined_call_operand.hbm [shape: f32[2,1,64], index: 6, kind: input, shape index: {}]   ;;  %s4352_s7 = inlined_call_operand.hbm [shape: bf16[2,64,32], index: 7, kind: input, shape index: {}]   ;;  %s4353_s8 = inlined_call_operand.hbm [shape: f32[2,1,32], index: 8, kind: input, shape index: {}]   ;;  %s4354_s9 = inlined_call_operand.hbm [shape: f32[2,1,32], index: 9, kind: input, shape index: {}]   ;;  %s4355_s10 = inlined_call_operand.hbm [shape: f32[2,1,32], index: 10, kind: input, shape index: {}]   ;;  %s4356_s11 = inlined_call_operand.hbm [shape: f32[2,1,32], index: 11, kind: input, shape index: {}]   ;;  %s4357_s12 = inlined_call_operand.hbm [shape: f32[2,1,32], index: 12, kind: input, shape index: {}]   ;;  %s4358_s13 = inlined_call_operand.hbm [shape: f32[2,8,32], index: 13, kind: output, shape index: {}]  }
   0x1   :  { %4377 = sst [smem:[#allocation37_spill]] %s4346_s1 }
   0x2   :  { %4378 = sst [smem:[#allocation38_spill]] %s4348_s3 }
   0x3   :  { %4379 = sst [smem:[#allocation39_spill]] %s4350_s5 }
   0x4   :  { %4380 = sst [smem:[#allocation40_spill]] %s4352_s7 }
   0x5   :  { %4381 = sst [smem:[#allocation41_spill]] %s4353_s8 }
   0x6   :  { %4382 = sst [smem:[#allocation42_spill]] %s4355_s10 }
   0x7   :  { %4383 = sst [smem:[#allocation43_spill]] %s4357_s12 }
   0x8   :  { %4384 = sst [smem:[#allocation44_spill]] %s4358_s13 }
   0x9   :  { %18 = vsyncpa [#allocation4], 0 }
   0xa   :  { %19 = vsyncpa [#allocation7], 0 }
   0xb   :  { %21 = vsyncpa [#allocation7 + $0x1], 0 }
   0xc   :  { %22 = vsyncpa [#allocation10], 0 }
   0xd   :  { %24 = vsyncpa [#allocation10 + $0x1], 0 }
   0xe   :  { %25 = vsyncpa [#allocation13], 0 }
   0xf   :  { %27 = vsyncpa [#allocation13 + $0x1], 0 }
  0x10   :  { %28 = vsyncpa [#allocation16], 0 }
  0x11   :  { %30 = vsyncpa [#allocation16 + $0x1], 0 }
  0x12   :  { %31 = vsyncpa [#allocation19], 0 }
  0x13   :  { %33 = vsyncpa [#allocation19 + $0x1], 0 }
  0x14   :  { %34 = vsyncpa [#allocation22], 0 }
  0x15   :  { %36 = vsyncpa [#allocation22 + $0x1], 0 }
  0x16   :  { %37 = vsyncpa [#allocation5], 0  ;;  %s3557_s25 = smov 0   ;;  %s3559_s26 = smov 0  }
  0x17   :  { %s3561_s27 = smov 0   ;;  %s3563_s28 = smov 0  }
  0x18   :  { %s3565_s29 = smov 0   ;;  %s3567_s30 = smov 0  }
  0x19 LB: > { %4385 = sst [smem:[#allocation33_spill]] %s3438_s27  ;;  %s52_s14 = sadd.s32 1, %s3446_s29  ;;  %s3450_s30 = sphi %s3567_s30, %s43_s30   ;;  %s3446_s29 = sphi %s3565_s29, %s4433_s29   ;;  %s3442_s28 = sphi %s3563_s28, %s4432_s28   ;;  %s3438_s27 = sphi %s3561_s27, %s4431_s27   ;;  %s3434_s26 = sphi %s3559_s26, %s4430_s26   ;;  %s3430_s25 = sphi %s3557_s25, %s4429_s25  }
  0x1a   : > { %4386 = sst [smem:[#allocation34_spill]] %s3442_s28  ;;  %s88_s15 = sadd.s32 1, %s3438_s27 }
  0x1b   : > { %p53_p0 = scmp.ge.s32.totalorder %s52_s14, 2  ;;  %p95_p1 = scmp.ne.s32.totalorder %s3438_s27, %s3434_s26 }
  0x1c   : > { %p96_p2 = scmp.eq.s32.totalorder %s3450_s30, 0  ;;  %p2818_p4 = scmp.lt.s32.totalorder %s3450_s30, 2 }
  0x1d   : > { %s4435_s14 = smov (%p53_p0, %s52_s14), 0  ;;  %s3598_s17 = sand.u32 1, %s3450_s30  }
  0x1e   : > { %4387 = sst [smem:[#allocation35_spill]] %s4435_s14  ;;  %p97_p3 = por %p96_p2, %p95_p1 }
  0x1f   : > { %s85_s16 = ssub.s32 %s3446_s29, %s4435_s14  ;;  %s3601_s18 = sand.u32 1, %s3438_s27  }
  0x20   : > { %p86_p5 = scmp.eq.s32.totalorder %s85_s16, 0  ;;  %s3604_s19 = sshll.u32 %s3446_s29, 8 }
  0x21   : > { %s3610_s21 = sshll.u32 %s3601_s18, 4  ;;  %s4389_s1 = sld [smem:[#allocation37_spill]] }
  0x22   : > { %s3607_s20 = scalar_select %p86_p5, %s3438_s27, %s88_s15  }
  0x23   : > { %p3618_p6 = pnand %p2818_p4, %p97_p3  ;;  %s457_s14 = scalar_lea.vmem [#allocation6], %s3610_s21 }
  0x24   : > { %4388 = sst [smem:[#allocation36_spill]] %s3607_s20  ;;  %s464_s15 = sshll.u32 %s457_s14, 4  ;;  %s3623_s15 = int_to_ptr.vmem [resolvable:$true] %s464_s15 }
  0x25   : > { %s4390_s16 = scalar_select %p3618_p6, 1, 0 }
  0x26   : > { %p3630_p8 = pneg %p3618_p6 }
  0x27   : > { %s3616_s24 = scalar_lea.hbm %s4389_s1, %s3604_s19  ;;  %s2963_s28 = scalar_lea.hbm %s4389_s1, 512 }
  0x28   : > { %s2958_s27 = scalar_lea.hbm %s3616_s24, 256  ;;  %p2964_p11 = scmp.lt.u32.totalorder %s3616_s24, %s4389_s1 }
  0x29   : > { %p2959_p7 = scmp.ne.s32.totalorder %s3616_s24, %s2958_s27  ;;  %p2965_p12 = scmp.lt.u32.totalorder %s2963_s28, %s2958_s27 }
  0x2a   : > { %s4391_s22 = scalar_select %p3630_p8, 1, 0 }
  0x2b   : > { %p2961_p9 = pnand %p3630_p8, %p2959_p7  ;;  %p2966_p13 = por %p2965_p12, %p2964_p11 }
  0x2c   : > { %p2967_p0 = scmp.lt.u32.totalorder %s2958_s27, %s3616_s24 }
  0x2d   : > { %p2962_p10 = pneg %p2961_p9 }
  0x2e   : > { %p2968_p1 = por %p2967_p0, %p2966_p13 }
  0x30   : > { %p2969_p2 = pnand %p2968_p1, %p2962_p10 }
  0x32   : > { %2972 = shalt.err (!%p2969_p2)
}
  0x33   : > { %s2973_s20 = scalar_lea.vmem %s3623_s15, 256  ;;  %s3452_s13 = smov [#allocation6]  }
  0x34   : > { %p2974_p3 = scmp.ne.s32.totalorder %s3623_s15, %s2973_s20  ;;  %s2978_s23 = sshll.u32 %s3452_s13, 4  ;;  %s2979_s23 = int_to_ptr.vmem [resolvable:$false] %s2978_s23 }
  0x35   : > { %s2980_s12 = scalar_lea.vmem %s2979_s23, 512  ;;  %p2981_p7 = scmp.lt.s32.totalorder %s3623_s15, %s2979_s23 }
  0x36   : > { %p2976_p4 = pnand %p2974_p3, %p3630_p8  ;;  %p2982_p9 = scmp.lt.s32.totalorder %s2980_s12, %s2973_s20 }
  0x38   : > { %p2977_p5 = pneg %p2976_p4  ;;  %p2983_p11 = por %p2982_p9, %p2981_p7 }
  0x3a   : > { %p2984_p12 = pnand %p2983_p11, %p2977_p5 }
  0x3c   : > { %2987 = shalt.err (!%p2984_p12)
}
  0x3d   : > { %s3453_s27 = smov 64   ;;  %s3454_s28 = smov 4  }
  0x3e   : > { %s4392_s14 = scalar_lea.sflag [#allocation7], %s3598_s17  ;;  %s4393_s3 = sld [smem:[#allocation38_spill]] }
  0x3f   : > { %2783 = dma.hbm_to_vmem [thread:$0]  (!%p3618_p6), %s3616_s24, 256, %s3623_s15, %s4392_s14, %s3453_s27, %s3453_s27, %s3454_s28  }
  0x40   : > { %s495_s12 = scalar_lea.vmem [#allocation9], %s3610_s21  ;;  %s4365_s10 = scalar_lea.sflag [#allocation10], %s3598_s17 }
  0x41   : > { %s502_s1 = sshll.u32 %s495_s12, 4  ;;  %s3665_s1 = int_to_ptr.vmem [resolvable:$true] %s502_s1 }
  0x44   : > { %s3662_s23 = scalar_lea.hbm %s4393_s3, %s3604_s19  ;;  %s2993_s14 = scalar_lea.hbm %s4393_s3, 512 }
  0x45   : > { %s2988_s8 = scalar_lea.hbm %s3662_s23, 256  ;;  %p2994_p1 = scmp.lt.u32.totalorder %s3662_s23, %s4393_s3 }
  0x46   : > { %p2989_p10 = scmp.ne.s32.totalorder %s3662_s23, %s2988_s8  ;;  %p2995_p2 = scmp.lt.u32.totalorder %s2993_s14, %s2988_s8 }
  0x47   : > { %p2997_p4 = scmp.lt.u32.totalorder %s2988_s8, %s3662_s23 }
  0x48   : > { %p2991_p13 = pnand %p2989_p10, %p3630_p8  ;;  %p2996_p3 = por %p2995_p2, %p2994_p1 }
  0x4a   : > { %p2992_p0 = pneg %p2991_p13  ;;  %p2998_p5 = por %p2997_p4, %p2996_p3 }
  0x4c   : > { %p2999_p7 = pnand %p2998_p5, %p2992_p0 }
  0x4e   : > { %3002 = shalt.err (!%p2999_p7)
}
  0x4f   : > { %s3003_s12 = scalar_lea.vmem %s3665_s1, 256  ;;  %s3455_s24 = smov [#allocation9]  }
  0x50   : > { %p3004_p9 = scmp.ne.s32.totalorder %s3665_s1, %s3003_s12  ;;  %s3008_s15 = sshll.u32 %s3455_s24, 4  ;;  %s3009_s15 = int_to_ptr.vmem [resolvable:$false] %s3008_s15 }
  0x51   : > { %s3010_s20 = scalar_lea.vmem %s3009_s15, 512  ;;  %p3011_p10 = scmp.lt.s32.totalorder %s3665_s1, %s3009_s15 }
  0x52   : > { %p3006_p11 = pnand %p3004_p9, %p3630_p8  ;;  %p3012_p13 = scmp.lt.s32.totalorder %s3010_s20, %s3003_s12 }
  0x54   : > { %p3007_p12 = pneg %p3006_p11  ;;  %p3013_p1 = por %p3012_p13, %p3011_p10 }
  0x56   : > { %p3014_p2 = pnand %p3013_p1, %p3007_p12 }
  0x58   : > { %3017 = shalt.err (!%p3014_p2)
}
  0x59   : > { %2789 = dma.hbm_to_vmem [thread:$0]  (!%p3618_p6), %s3662_s23, 256, %s3665_s1, %s4365_s10, %s3453_s27, %s3453_s27, %s3454_s28  }
  0x5a   : > { %s4394_s5 = sld [smem:[#allocation39_spill]]  ;;  %s533_s12 = scalar_lea.vmem [#allocation12], %s3610_s21 }
  0x5b   : > { %s540_s24 = sshll.u32 %s533_s12, 4  ;;  %s4371_s15 = scalar_lea.sflag [#allocation13], %s3598_s17  ;;  %s3701_s24 = int_to_ptr.vmem [resolvable:$true] %s540_s24 }
  0x60   : > { %s3698_s13 = scalar_lea.hbm %s4394_s5, %s3604_s19  ;;  %s3023_s8 = scalar_lea.hbm %s4394_s5, 512 }
  0x61   : > { %s3018_s20 = scalar_lea.hbm %s3698_s13, 256  ;;  %p3024_p5 = scmp.lt.u32.totalorder %s3698_s13, %s4394_s5 }
  0x62   : > { %p3019_p0 = scmp.ne.s32.totalorder %s3698_s13, %s3018_s20  ;;  %p3025_p7 = scmp.lt.u32.totalorder %s3023_s8, %s3018_s20 }
  0x63   : > { %p3027_p11 = scmp.lt.u32.totalorder %s3018_s20, %s3698_s13 }
  0x64   : > { %p3021_p3 = pnand %p3019_p0, %p3630_p8  ;;  %p3026_p9 = por %p3025_p7, %p3024_p5 }
  0x66   : > { %p3022_p4 = pneg %p3021_p3  ;;  %p3028_p12 = por %p3027_p11, %p3026_p9 }
  0x68   : > { %p3029_p10 = pnand %p3028_p12, %p3022_p4 }
  0x6a   : > { %3032 = shalt.err (!%p3029_p10)
}
  0x6b   : > { %s3033_s21 = scalar_lea.vmem %s3701_s24, 256  ;;  %s3456_s12 = smov [#allocation12]  }
  0x6c   : > { %p3034_p13 = scmp.ne.s32.totalorder %s3701_s24, %s3033_s21  ;;  %s3038_s1 = sshll.u32 %s3456_s12, 4  ;;  %s3039_s1 = int_to_ptr.vmem [resolvable:$false] %s3038_s1 }
  0x6d   : > { %s3040_s23 = scalar_lea.vmem %s3039_s1, 512  ;;  %p3041_p0 = scmp.lt.s32.totalorder %s3701_s24, %s3039_s1 }
  0x6e   : > { %p3036_p1 = pnand %p3034_p13, %p3630_p8  ;;  %p3042_p3 = scmp.lt.s32.totalorder %s3040_s23, %s3033_s21 }
  0x70   : > { %p3037_p2 = pneg %p3036_p1  ;;  %p3043_p5 = por %p3042_p3, %p3041_p0 }
  0x72   : > { %p3044_p7 = pnand %p3043_p5, %p3037_p2 }
  0x74   : > { %3047 = shalt.err (!%p3044_p7)
}
  0x75   : > { %2795 = dma.hbm_to_vmem [thread:$0]  (!%p3618_p6), %s3698_s13, 256, %s3701_s24, %s4371_s15, %s3453_s27, %s3453_s27, %s3454_s28  }
  0x76   : > { %s2504_s20 = sshll.u32 %s3601_s18, 5  ;;  %s2565_s8 = sshll.u32 %s3446_s29, 9 }
  0x77   : > { %s4395_s7 = sld [smem:[#allocation40_spill]]  ;;  %s571_s12 = scalar_lea.vmem [#allocation15], %s2504_s20 }
  0x78   : > { %s578_s1 = sshll.u32 %s571_s12, 4  ;;  %s3738_s23 = sshll.u32 %s3446_s29, 4  ;;  %s3740_s1 = int_to_ptr.vmem [resolvable:$true] %s578_s1 }
  0x79   : > { %s4370_s10 = scalar_lea.sflag [#allocation16], %s3598_s17 }
  0x7d   : > { %s3735_s21 = scalar_lea.hbm %s4395_s7, %s2565_s8  ;;  %s3053_s8 = scalar_lea.hbm %s4395_s7, 1024 }
  0x7e   : > { %s3048_s3 = scalar_lea.hbm %s3735_s21, 512  ;;  %p3054_p12 = scmp.lt.u32.totalorder %s3735_s21, %s4395_s7 }
  0x7f   : > { %p3049_p4 = scmp.ne.s32.totalorder %s3735_s21, %s3048_s3  ;;  %p3055_p10 = scmp.lt.u32.totalorder %s3053_s8, %s3048_s3 }
  0x80   : > { %p3057_p1 = scmp.lt.u32.totalorder %s3048_s3, %s3735_s21 }
  0x81   : > { %p3051_p9 = pnand %p3049_p4, %p3630_p8  ;;  %p3056_p13 = por %p3055_p10, %p3054_p12 }
  0x83   : > { %p3052_p11 = pneg %p3051_p9  ;;  %p3058_p2 = por %p3057_p1, %p3056_p13 }
  0x85   : > { %p3059_p0 = pnand %p3058_p2, %p3052_p11 }
  0x87   : > { %3062 = shalt.err (!%p3059_p0)
}
  0x88   : > { %s3063_s20 = scalar_lea.vmem %s3740_s1, 512  ;;  %s3457_s12 = smov [#allocation15]  }
  0x89   : > { %p3064_p3 = scmp.ne.s32.totalorder %s3740_s1, %s3063_s20  ;;  %s3068_s13 = sshll.u32 %s3457_s12, 4  ;;  %s3069_s13 = int_to_ptr.vmem [resolvable:$false] %s3068_s13 }
  0x8a   : > { %s3070_s24 = scalar_lea.vmem %s3069_s13, 1024  ;;  %p3071_p4 = scmp.lt.s32.totalorder %s3740_s1, %s3069_s13 }
  0x8b   : > { %p3066_p5 = pnand %p3064_p3, %p3630_p8  ;;  %p3072_p9 = scmp.lt.s32.totalorder %s3070_s24, %s3063_s20 }
  0x8d   : > { %p3067_p7 = pneg %p3066_p5  ;;  %p3073_p12 = por %p3072_p9, %p3071_p4 }
  0x8f   : > { %p3074_p10 = pnand %p3073_p12, %p3067_p7 }
  0x91   : > { %3077 = shalt.err (!%p3074_p10)
}
  0x92   : > { %2801 = dma.hbm_to_vmem [thread:$0]  (!%p3618_p6), %s3735_s21, 512, %s3740_s1, %s4370_s10, %s3453_s27, %s3453_s27, %s3454_s28  }
  0x93   : > { %s3773_s19 = scalar_lea.hbm %s4354_s9, %s3738_s23  ;;  %s608_s14 = scalar_lea.vmem [#allocation18], %s3601_s18 }
  0x94   : > { %s615_s20 = sshll.u32 %s608_s14, 4  ;;  %s4368_s12 = scalar_lea.sflag [#allocation19], %s3598_s17  ;;  %s616_s20 = int_to_ptr.vmem [resolvable:$true] %s615_s20 }
  0x95   : > { %s3078_s13 = scalar_lea.hbm %s3773_s19, 16  ;;  %s3083_s28 = scalar_lea.hbm %s4354_s9, 32 }
  0x96   : > { %p3079_p11 = scmp.ne.s32.totalorder %s3773_s19, %s3078_s13  ;;  %p3084_p2 = scmp.lt.u32.totalorder %s3773_s19, %s4354_s9 }
  0x97   : > { %p3085_p0 = scmp.lt.u32.totalorder %s3083_s28, %s3078_s13  ;;  %p3087_p5 = scmp.lt.u32.totalorder %s3078_s13, %s3773_s19 }
  0x98   : > { %p3081_p13 = pnand %p3079_p11, %p3630_p8 }
  0x99   : > { %p3086_p3 = por %p3085_p0, %p3084_p2 }
  0x9a   : > { %p3082_p1 = pneg %p3081_p13 }
  0x9b   : > { %p3088_p7 = por %p3087_p5, %p3086_p3 }
  0x9d   : > { %p3089_p4 = pnand %p3088_p7, %p3082_p1 }
  0x9f   : > { %3092 = shalt.err (!%p3089_p4)
}
  0xa0   : > { %s3093_s3 = scalar_lea.vmem %s616_s20, 16  ;;  %s3458_s8 = smov [#allocation18]  }
  0xa1   : > { %p3094_p9 = scmp.ne.s32.totalorder %s616_s20, %s3093_s3  ;;  %s3098_s14 = sshll.u32 %s3458_s8, 4  ;;  %s3099_s14 = int_to_ptr.vmem [resolvable:$false] %s3098_s14 }
  0xa2   : > { %s3100_s24 = scalar_lea.vmem %s3099_s14, 32  ;;  %p3101_p11 = scmp.lt.s32.totalorder %s616_s20, %s3099_s14 }
  0xa3   : > { %p3096_p12 = pnand %p3094_p9, %p3630_p8  ;;  %p3102_p13 = scmp.lt.s32.totalorder %s3100_s24, %s3093_s3 }
  0xa5   : > { %p3097_p10 = pneg %p3096_p12  ;;  %p3103_p6 = por %p3102_p13, %p3101_p11 }
  0xa7   : > { %p3104_p0 = pnand %p3103_p6, %p3097_p10 }
  0xa9   : > { %3107 = shalt.err (!%p3104_p0)
}
  0xaa   : > { %p4396_p2 = scmp.ne.s32.totalorder %s4390_s16, 0  ;;  %s3800_s28 = scalar_lea.hbm %s4356_s11, %s3738_s23 }
  0xab   : > { %s642_s21 = scalar_lea.vmem [#allocation21], %s3601_s18  ;;  %s4369_s3 = scalar_lea.sflag [#allocation22], %s3598_s17 }
  0xac   : > { %2807 = dma.hbm_to_vmem [thread:$0]  (!%p4396_p2), %s3773_s19, 16, %s616_s20, %s4368_s12  }
  0xad   : > { %s649_s1 = sshll.u32 %s642_s21, 4  ;;  %s3108_s8 = scalar_lea.hbm %s3800_s28, 16  ;;  %s650_s1 = int_to_ptr.vmem [resolvable:$true] %s649_s1 }
  0xae   : > { %p3109_p6 = scmp.ne.s32.totalorder %s3800_s28, %s3108_s8  ;;  %s3113_s20 = scalar_lea.hbm %s4356_s11, 32 }
  0xaf   : > { %p3114_p5 = scmp.lt.u32.totalorder %s3800_s28, %s4356_s11  ;;  %p3115_p7 = scmp.lt.u32.totalorder %s3113_s20, %s3108_s8 }
  0xb0   : > { %p3111_p1 = pnand %p3109_p6, %p3630_p8  ;;  %p3117_p9 = scmp.lt.u32.totalorder %s3108_s8, %s3800_s28 }
  0xb1   : > { %p3116_p4 = por %p3115_p7, %p3114_p5 }
  0xb2   : > { %p3112_p3 = pneg %p3111_p1 }
  0xb3   : > { %p3118_p12 = por %p3117_p9, %p3116_p4 }
  0xb5   : > { %p3119_p10 = pnand %p3118_p12, %p3112_p3 }
  0xb7   : > { %3122 = shalt.err (!%p3119_p10)
}
  0xb8   : > { %s3123_s27 = scalar_lea.vmem %s650_s1, 16  ;;  %s3459_s21 = smov [#allocation21]  }
  0xb9   : > { %p3124_p11 = scmp.ne.s32.totalorder %s650_s1, %s3123_s27  ;;  %s3128_s12 = sshll.u32 %s3459_s21, 4  ;;  %s3129_s12 = int_to_ptr.vmem [resolvable:$false] %s3128_s12 }
  0xba   : > { %s3130_s14 = scalar_lea.vmem %s3129_s12, 32  ;;  %p3131_p6 = scmp.lt.s32.totalorder %s650_s1, %s3129_s12 }
  0xbb   : > { %p3126_p13 = pnand %p3124_p11, %p3630_p8  ;;  %p3132_p1 = scmp.lt.s32.totalorder %s3130_s14, %s3123_s27 }
  0xbd   : > { %p3127_p0 = pneg %p3126_p13  ;;  %p3133_p2 = por %p3132_p1, %p3131_p6 }
  0xbf   : > { %p3134_p5 = pnand %p3133_p2, %p3127_p0 }
  0xc1   : > { %3137 = shalt.err (!%p3134_p5)
}
  0xc2   : > { %p4397_p7 = scmp.ne.s32.totalorder %s4390_s16, 0  ;;  %s3824_s8 = sadd.s32 4294967295, %s3450_s30  }
  0xc3   : > { %p101_p2 = scmp.ne.s32.totalorder %s3434_s26, %s3430_s25  ;;  %p4372_p3 = scmp.eq.s32.totalorder %s3824_s8, 0 }
  0xc4   : > { %2813 = dma.hbm_to_vmem [thread:$0]  (!%p4397_p7), %s3800_s28, 16, %s650_s1, %s4369_s3  }
  0xc5   : > { %p2489_p4 = scmp.ge.s32.totalorder %s3450_s30, 1  ;;  %p424_p9 = scmp.lt.s32.totalorder %s3450_s30, 3 }
  0xc6   : > { %p3833_p12 = por %p4372_p3, %p101_p2  ;;  %s3460_s28 = smov [#allocation3]  }
  0xc7   : > { %p3837_p10 = pnand %p2489_p4, %p424_p9  ;;  %s439_s1 = sshll.u32 %s3460_s28, 4  ;;  %s440_s1 = int_to_ptr.vmem [resolvable:$true] %s439_s1 }
  0xc8   : > { %s4398_s12 = scalar_select %p3833_p12, 1, 0 }
  0xc9   : > { %s4399_s19 = scalar_select %p3837_p10, 1, 0 }
  0xca   : > { %p2776_p11 = pneg %p3837_p10  ;;  %s3853_s13 = scalar_lea.hbm %s4347_s2, %s3738_s23 }
  0xcb   : > { %s477_s27 = scalar_lea.vmem [#allocation8], %s3601_s18  ;;  %s3138_s3 = scalar_lea.hbm %s4345_s0, 256 }
  0xcc   : > { %p3845_p13 = pnand %p2776_p11, %p4372_p3  ;;  %s484_s21 = sshll.u32 %s477_s27, 4  ;;  %s3856_s21 = int_to_ptr.vmem [resolvable:$true] %s484_s21 }
  0xcd   : > { %p3139_p0 = scmp.ne.s32.totalorder %s4345_s0, %s3138_s3  ;;  %p3145_p2 = scmp.lt.u32.totalorder %s3138_s3, %s4345_s0 }
  0xce   : > { %p3140_p6 = pneg %p3845_p13 }
  0xd0   : > { %p3141_p1 = pnand %p3140_p6, %p3139_p0 }
  0xd2   : > { %p3142_p5 = pneg %p3141_p1 }
  0xd4   : > { %p3147_p4 = pnand %p3145_p2, %p3142_p5 }
  0xd6   : > { %3150 = shalt.err (!%p3147_p4)
}
  0xd7   : > { %s3151_s27 = scalar_lea.vmem %s440_s1, 256  ;;  %p3159_p12 = scmp.lt.s32.totalorder %s440_s1, %s440_s1 }
  0xd8   : > { %p3152_p9 = scmp.ne.s32.totalorder %s440_s1, %s3151_s27  ;;  %p3160_p10 = scmp.lt.s32.totalorder %s3151_s27, %s3151_s27 }
  0xda   : > { %p3154_p11 = pnand %p3152_p9, %p3140_p6  ;;  %p3161_p7 = por %p3160_p10, %p3159_p12 }
  0xdc   : > { %p3155_p3 = pneg %p3154_p11 }
  0xde   : > { %p3162_p8 = pnand %p3161_p7, %p3155_p3 }
  0xe0   : > { %3165 = shalt.err (!%p3162_p8)
}
  0xe1   : > { %s3461_s10 = smov 128   ;;  %s3462_s15 = smov 8  }
  0xe2   : > { %2779 = dma.hbm_to_vmem [thread:$0]  (!%p3845_p13), %s4345_s0, 256, %s440_s1, [#allocation4], %s3461_s10, %s3461_s10, %s3462_s15  }
  0xe3   : > { %s3166_s28 = scalar_lea.hbm %s3853_s13, 16  ;;  %p4401_p6 = scmp.ne.s32.totalorder %s4391_s22, 0 }
  0xe4   : > { %p3167_p0 = scmp.ne.s32.totalorder %s3853_s13, %s3166_s28  ;;  %s3171_s27 = scalar_lea.hbm %s4347_s2, 32 }
  0xe5   : > { %p3172_p8 = scmp.lt.u32.totalorder %s3853_s13, %s4347_s2  ;;  %p3173_p7 = scmp.lt.u32.totalorder %s3171_s27, %s3166_s28 }
  0xe6   : > { %p3169_p1 = pnand %p3167_p0, %p4401_p6  ;;  %p3175_p10 = scmp.lt.u32.totalorder %s3166_s28, %s3853_s13 }
  0xe7   : > { %p3174_p3 = por %p3173_p7, %p3172_p8 }
  0xe8   : > { %p3170_p12 = pneg %p3169_p1 }
  0xe9   : > { %p3176_p5 = por %p3175_p10, %p3174_p3 }
  0xeb   : > { %p3177_p2 = pnand %p3176_p5, %p3170_p12 }
  0xed   : > { %3180 = shalt.err (!%p3177_p2)
}
  0xee   : > { %s3181_s1 = scalar_lea.vmem %s3856_s21, 16  ;;  %s3463_s25 = smov [#allocation8]  }
  0xef   : > { %p3182_p13 = scmp.ne.s32.totalorder %s3856_s21, %s3181_s1  ;;  %s3186_s10 = sshll.u32 %s3463_s25, 4  ;;  %s3187_s10 = int_to_ptr.vmem [resolvable:$false] %s3186_s10 }
  0xf0   : > { %s3188_s5 = scalar_lea.vmem %s3187_s10, 32  ;;  %p3189_p11 = scmp.lt.s32.totalorder %s3856_s21, %s3187_s10 }
  0xf1   : > { %p3184_p4 = pnand %p3182_p13, %p4401_p6  ;;  %p3190_p0 = scmp.lt.s32.totalorder %s3188_s5, %s3181_s1 }
  0xf3   : > { %p3185_p9 = pneg %p3184_p4  ;;  %p3191_p1 = por %p3190_p0, %p3189_p11 }
  0xf5   : > { %p3192_p8 = pnand %p3191_p1, %p3185_p9 }
  0xf7   : > { %3195 = shalt.err (!%p3192_p8)
}
  0xf8   : > { %p4402_p12 = scmp.ne.s32.totalorder %s4390_s16, 0  ;;  %s4403_s7 = scalar_lea.sflag [#allocation7], %s3598_s17 }
  0xf9   : > { %s3901_s14 = scalar_lea.hbm %s4349_s4, %s3738_s23  ;;  %s515_s28 = scalar_lea.vmem [#allocation11], %s3601_s18 }
  0xfa   : > { %2786 = dma.hbm_to_vmem [thread:$0]  (!%p4402_p12), %s3853_s13, 16, %s3856_s21, %s4403_s7  }
  0xfb   : > { %s522_s20 = sshll.u32 %s515_s28, 4  ;;  %s3196_s24 = scalar_lea.hbm %s3901_s14, 16  ;;  %s523_s20 = int_to_ptr.vmem [resolvable:$true] %s522_s20 }
  0xfc   : > { %p3197_p7 = scmp.ne.s32.totalorder %s3901_s14, %s3196_s24  ;;  %s3201_s13 = scalar_lea.hbm %s4349_s4, 32 }
  0xfd   : > { %p3202_p5 = scmp.lt.u32.totalorder %s3901_s14, %s4349_s4  ;;  %p3203_p2 = scmp.lt.u32.totalorder %s3201_s13, %s3196_s24 }
  0xfe   : > { %p3199_p3 = pnand %p3197_p7, %p4401_p6  ;;  %p3205_p4 = scmp.lt.u32.totalorder %s3196_s24, %s3901_s14 }
  0xff   : > { %p3204_p13 = por %p3203_p2, %p3202_p5 }
 0x100   : > { %p3200_p10 = pneg %p3199_p3 }
 0x101   : > { %p3206_p9 = por %p3205_p4, %p3204_p13 }
 0x103   : > { %p3207_p11 = pnand %p3206_p9, %p3200_p10 }
 0x105   : > { %3210 = shalt.err (!%p3207_p11)
}
 0x106   : > { %s3211_s10 = scalar_lea.vmem %s523_s20, 16  ;;  %s3464_s5 = smov [#allocation11]  }
 0x107   : > { %p3212_p0 = scmp.ne.s32.totalorder %s523_s20, %s3211_s10  ;;  %s3216_s7 = sshll.u32 %s3464_s5, 4  ;;  %s3217_s7 = int_to_ptr.vmem [resolvable:$false] %s3216_s7 }
 0x108   : > { %s3218_s15 = scalar_lea.vmem %s3217_s7, 32  ;;  %p3219_p7 = scmp.lt.s32.totalorder %s523_s20, %s3217_s7 }
 0x109   : > { %p3214_p1 = pnand %p3212_p0, %p4401_p6  ;;  %p3220_p3 = scmp.lt.s32.totalorder %s3218_s15, %s3211_s10 }
 0x10b   : > { %p3215_p8 = pneg %p3214_p1  ;;  %p3221_p12 = por %p3220_p3, %p3219_p7 }
 0x10d   : > { %p3222_p2 = pnand %p3221_p12, %p3215_p8 }
 0x10f   : > { %3225 = shalt.err (!%p3222_p2)
}
 0x110   : > { %p4404_p5 = scmp.ne.s32.totalorder %s4390_s16, 0  ;;  %s4405_s3 = scalar_lea.sflag [#allocation10], %s3598_s17 }
 0x111   : > { %s3927_s27 = scalar_lea.hbm %s4351_s6, %s3738_s23  ;;  %s553_s1 = scalar_lea.vmem [#allocation14], %s3601_s18 }
 0x112   : > { %2792 = dma.hbm_to_vmem [thread:$0]  (!%p4404_p5), %s3901_s14, 16, %s523_s20, %s4405_s3  }
 0x113   : > { %s560_s13 = sshll.u32 %s553_s1, 4  ;;  %s3226_s21 = scalar_lea.hbm %s3927_s27, 16  ;;  %s561_s13 = int_to_ptr.vmem [resolvable:$true] %s560_s13 }
 0x114   : > { %p3227_p12 = scmp.ne.s32.totalorder %s3927_s27, %s3226_s21  ;;  %s3231_s14 = scalar_lea.hbm %s4351_s6, 32 }
 0x115   : > { %p3232_p4 = scmp.lt.u32.totalorder %s3927_s27, %s4351_s6  ;;  %p3233_p9 = scmp.lt.u32.totalorder %s3231_s14, %s3226_s21 }
 0x116   : > { %p3229_p10 = pnand %p3227_p12, %p4401_p6  ;;  %p3235_p0 = scmp.lt.u32.totalorder %s3226_s21, %s3927_s27 }
 0x117   : > { %p3234_p11 = por %p3233_p9, %p3232_p4 }
 0x118   : > { %p3230_p13 = pneg %p3229_p10 }
 0x119   : > { %p3236_p1 = por %p3235_p0, %p3234_p11 }
 0x11b   : > { %p3237_p8 = pnand %p3236_p1, %p3230_p13 }
 0x11d   : > { %3240 = shalt.err (!%p3237_p8)
}
 0x11e   : > { %s3241_s7 = scalar_lea.vmem %s561_s13, 16  ;;  %s3465_s15 = smov [#allocation14]  }
 0x11f   : > { %p3242_p7 = scmp.ne.s32.totalorder %s561_s13, %s3241_s7  ;;  %s3246_s3 = sshll.u32 %s3465_s15, 4  ;;  %s3247_s3 = int_to_ptr.vmem [resolvable:$false] %s3246_s3 }
 0x120   : > { %s3248_s28 = scalar_lea.vmem %s3247_s3, 32  ;;  %p3249_p12 = scmp.lt.s32.totalorder %s561_s13, %s3247_s3 }
 0x121   : > { %p3244_p3 = pnand %p3242_p7, %p4401_p6  ;;  %p3250_p10 = scmp.lt.s32.totalorder %s3248_s28, %s3241_s7 }
 0x123   : > { %p3245_p2 = pneg %p3244_p3  ;;  %p3251_p5 = por %p3250_p10, %p3249_p12 }
 0x125   : > { %p3252_p4 = pnand %p3251_p5, %p3245_p2 }
 0x127   : > { %3255 = shalt.err (!%p3252_p4)
}
 0x128   : > { %p4406_p9 = scmp.ne.s32.totalorder %s4390_s16, 0  ;;  %s4407_s24 = scalar_lea.sflag [#allocation13], %s3598_s17 }
 0x129   : > { %s4408_s25 = sld [smem:[#allocation41_spill]]  ;;  %s591_s20 = scalar_lea.vmem [#allocation17], %s3601_s18 }
 0x12a   : > { %2798 = dma.hbm_to_vmem [thread:$0]  (!%p4406_p9), %s3927_s27, 16, %s561_s13, %s4407_s24  }
 0x12b   : > { %s598_s5 = sshll.u32 %s591_s20, 4  ;;  %s599_s5 = int_to_ptr.vmem [resolvable:$true] %s598_s5 }
 0x12f   : > { %s4409_s10 = smov %s4408_s25  ;;  %s3953_s14 = scalar_lea.hbm %s4408_s25, %s3738_s23 }
 0x130   : > { %s3256_s7 = scalar_lea.hbm %s3953_s14, 16  ;;  %s3261_s27 = scalar_lea.hbm %s4409_s10, 32 }
 0x131   : > { %p3257_p5 = scmp.ne.s32.totalorder %s3953_s14, %s3256_s7  ;;  %p3262_p0 = scmp.lt.u32.totalorder %s3953_s14, %s4409_s10 }
 0x132   : > { %p3263_p1 = scmp.lt.u32.totalorder %s3261_s27, %s3256_s7  ;;  %p3265_p7 = scmp.lt.u32.totalorder %s3256_s7, %s3953_s14 }
 0x133   : > { %p3259_p13 = pnand %p3257_p5, %p4401_p6 }
 0x134   : > { %p3264_p8 = por %p3263_p1, %p3262_p0 }
 0x135   : > { %p3260_p11 = pneg %p3259_p13 }
 0x136   : > { %p3266_p3 = por %p3265_p7, %p3264_p8 }
 0x138   : > { %p3267_p2 = pnand %p3266_p3, %p3260_p11 }
 0x13a   : > { %3270 = shalt.err (!%p3267_p2)
}
 0x13b   : > { %s3271_s24 = scalar_lea.vmem %s599_s5, 16  ;;  %s3466_s1 = smov [#allocation17]  }
 0x13c   : > { %p3272_p12 = scmp.ne.s32.totalorder %s599_s5, %s3271_s24  ;;  %s3276_s21 = sshll.u32 %s3466_s1, 4  ;;  %s3277_s21 = int_to_ptr.vmem [resolvable:$false] %s3276_s21 }
 0x13d   : > { %s3278_s25 = scalar_lea.vmem %s3277_s21, 32  ;;  %p3279_p5 = scmp.lt.s32.totalorder %s599_s5, %s3277_s21 }
 0x13e   : > { %p3274_p10 = pnand %p3272_p12, %p4401_p6  ;;  %p3280_p13 = scmp.lt.s32.totalorder %s3278_s25, %s3271_s24 }
 0x140   : > { %p3275_p4 = pneg %p3274_p10  ;;  %p3281_p9 = por %p3280_p13, %p3279_p5 }
 0x142   : > { %p3282_p0 = pnand %p3281_p9, %p3275_p4 }
 0x144   : > { %3285 = shalt.err (!%p3282_p0)
}
 0x145   : > { %p4410_p1 = scmp.ne.s32.totalorder %s4390_s16, 0  ;;  %s4411_s20 = scalar_lea.sflag [#allocation16], %s3598_s17 }
 0x146   : > { %s4412_s3 = sld [smem:[#allocation42_spill]]  ;;  %s625_s13 = scalar_lea.vmem [#allocation20], %s3601_s18 }
 0x147   : > { %2804 = dma.hbm_to_vmem [thread:$0]  (!%p4410_p1), %s3953_s14, 16, %s599_s5, %s4411_s20  }
 0x148   : > { %s632_s28 = sshll.u32 %s625_s13, 4  ;;  %s633_s28 = int_to_ptr.vmem [resolvable:$true] %s632_s28 }
 0x14c   : > { %s3979_s27 = scalar_lea.hbm %s4412_s3, %s3738_s23  ;;  %s3291_s14 = scalar_lea.hbm %s4412_s3, 32 }
 0x14d   : > { %s3286_s24 = scalar_lea.hbm %s3979_s27, 16  ;;  %p3292_p7 = scmp.lt.u32.totalorder %s3979_s27, %s4412_s3 }
 0x14e   : > { %p3287_p9 = scmp.ne.s32.totalorder %s3979_s27, %s3286_s24  ;;  %p3293_p3 = scmp.lt.u32.totalorder %s3291_s14, %s3286_s24 }
 0x14f   : > { %p3295_p12 = scmp.lt.u32.totalorder %s3286_s24, %s3979_s27 }
 0x150   : > { %p3289_p11 = pnand %p3287_p9, %p4401_p6  ;;  %p3294_p2 = por %p3293_p3, %p3292_p7 }
 0x152   : > { %p3290_p8 = pneg %p3289_p11  ;;  %p3296_p10 = por %p3295_p12, %p3294_p2 }
 0x154   : > { %p3297_p4 = pnand %p3296_p10, %p3290_p8 }
 0x156   : > { %3300 = shalt.err (!%p3297_p4)
}
 0x157   : > { %s3301_s20 = scalar_lea.vmem %s633_s28, 16  ;;  %s3467_s7 = smov [#allocation20]  }
 0x158   : > { %p3302_p5 = scmp.ne.s32.totalorder %s633_s28, %s3301_s20  ;;  %s3306_s15 = sshll.u32 %s3467_s7, 4  ;;  %s3307_s15 = int_to_ptr.vmem [resolvable:$false] %s3306_s15 }
 0x159   : > { %s3308_s13 = scalar_lea.vmem %s3307_s15, 32  ;;  %p3309_p9 = scmp.lt.s32.totalorder %s633_s28, %s3307_s15 }
 0x15a   : > { %p3304_p13 = pnand %p3302_p5, %p4401_p6  ;;  %p3310_p11 = scmp.lt.s32.totalorder %s3308_s13, %s3301_s20 }
 0x15c   : > { %p3305_p0 = pneg %p3304_p13  ;;  %p3311_p1 = por %p3310_p11, %p3309_p9 }
 0x15e   : > { %p3312_p3 = pnand %p3311_p1, %p3305_p0 }
 0x160   : > { %3315 = shalt.err (!%p3312_p3)
}
 0x161   : > { %p4413_p7 = scmp.ne.s32.totalorder %s4390_s16, 0  ;;  %s4414_s24 = scalar_lea.sflag [#allocation19], %s3598_s17 }
 0x162   : > { %s4415_s14 = sld [smem:[#allocation43_spill]]  ;;  %s659_s25 = scalar_lea.vmem [#allocation23], %s3601_s18 }
 0x163   : > { %2810 = dma.hbm_to_vmem [thread:$0]  (!%p4413_p7), %s3979_s27, 16, %s633_s28, %s4414_s24  }
 0x164   : > { %s666_s20 = sshll.u32 %s659_s25, 4  ;;  %s667_s20 = int_to_ptr.vmem [resolvable:$true] %s666_s20 }
 0x168   : > { %s4005_s5 = scalar_lea.hbm %s4415_s14, %s3738_s23  ;;  %s3321_s27 = scalar_lea.hbm %s4415_s14, 32 }
 0x169   : > { %s3316_s7 = scalar_lea.hbm %s4005_s5, 16  ;;  %p3322_p12 = scmp.lt.u32.totalorder %s4005_s5, %s4415_s14 }
 0x16a   : > { %p3317_p1 = scmp.ne.s32.totalorder %s4005_s5, %s3316_s7  ;;  %p3323_p10 = scmp.lt.u32.totalorder %s3321_s27, %s3316_s7 }
 0x16b   : > { %p3325_p5 = scmp.lt.u32.totalorder %s3316_s7, %s4005_s5 }
 0x16c   : > { %p3319_p8 = pnand %p3317_p1, %p4401_p6  ;;  %p3324_p4 = por %p3323_p10, %p3322_p12 }
 0x16e   : > { %p3320_p2 = pneg %p3319_p8  ;;  %p3326_p13 = por %p3325_p5, %p3324_p4 }
 0x170   : > { %p3327_p0 = pnand %p3326_p13, %p3320_p2 }
 0x172   : > { %3330 = shalt.err (!%p3327_p0)
}
 0x173   : > { %s3331_s18 = scalar_lea.vmem %s667_s20, 16  ;;  %s3468_s23 = smov [#allocation23]  }
 0x174   : > { %p3332_p9 = scmp.ne.s32.totalorder %s667_s20, %s3331_s18  ;;  %s3336_s1 = sshll.u32 %s3468_s23, 4  ;;  %s3337_s1 = int_to_ptr.vmem [resolvable:$false] %s3336_s1 }
 0x175   : > { %s3338_s21 = scalar_lea.vmem %s3337_s1, 32  ;;  %p3339_p1 = scmp.lt.s32.totalorder %s667_s20, %s3337_s1 }
 0x176   : > { %p3334_p11 = pnand %p3332_p9, %p4401_p6  ;;  %p3340_p8 = scmp.lt.s32.totalorder %s3338_s21, %s3331_s18 }
 0x178   : > { %p3335_p3 = pneg %p3334_p11  ;;  %p3341_p7 = por %p3340_p8, %p3339_p1 }
 0x17a   : > { %p3342_p10 = pnand %p3341_p7, %p3335_p3 }
 0x17c   : > { %3345 = shalt.err (!%p3342_p10)
}
 0x17d   : > { %p4416_p12 = scmp.ne.s32.totalorder %s4390_s16, 0  ;;  %s4417_s25 = scalar_lea.sflag [#allocation22], %s3598_s17 }
 0x17e   : > { %p4418_p2 = scmp.ne.s32.totalorder %s4399_s19, 0 }
 0x17f   : > { %2816 = dma.hbm_to_vmem [thread:$0]  (!%p4416_p12), %s4005_s5, 16, %s667_s20, %s4417_s25  }
 0x180   : > { %675 = sbr.rel (%p4418_p2) target bundleno = 4573 (0x11dd), region = 72  ;;  %p4419_p6 = scmp.eq.s32.totalorder (!%p4418_p2), %s3824_s8, 0 }
 0x187   : > { %3397 = dma.done.wait (%p4419_p6), [#allocation4], 256   ;;  %p4420_p4 = pmov %p4419_p6 }
 0x188   : > { %s4034_s22 = sand.u32 1, %s3824_s8   ;;  %s4037_s16 = sand.u32 1, %s3434_s26  }
 0x189   : > { %3399 = vsyncadd (%p4420_p4), [#allocation4], 4294967040  ;;  %s4040_s17 = sshll.u32 %s4037_s16, 4  ;;  %s682_s19 = scalar_lea.sflag [#allocation7], %s4034_s22 }
 0x18a   : > { %s685_s5 = scalar_lea.vmem [#allocation6], %s4040_s17  ;;  %p4421_p7 = scmp.ne.s32.totalorder %s4398_s12, 0 }
 0x18c   : > { %3401 = dma.done.wait (%p4421_p7), %s682_s19, 272  }
 0x18d   : > { %3403 = vsyncadd (%p4421_p7), %s682_s19, 4294967024  ;;  %s693_s20 = scalar_lea.vmem [#allocation8], %s4037_s16  ;;  %s699_s7 = scalar_lea.sflag [#allocation10], %s4034_s22 }
 0x18e   : > { %s702_s15 = scalar_lea.vmem [#allocation9], %s4040_s17 }
 0x18f   : > { %3405 = dma.done.wait (%p4421_p7), %s699_s7, 272  }
 0x190   : > { %3407 = vsyncadd (%p4421_p7), %s699_s7, 4294967024  ;;  %s710_s13 = scalar_lea.vmem [#allocation11], %s4037_s16  ;;  %s716_s27 = scalar_lea.sflag [#allocation13], %s4034_s22 }
 0x191   : > { %s719_s28 = scalar_lea.vmem [#allocation12], %s4040_s17 }
 0x192   : > { %3409 = dma.done.wait (%p4421_p7), %s716_s27, 272  }
 0x193   : > { %3411 = vsyncadd (%p4421_p7), %s716_s27, 4294967024  ;;  %s2517_s24 = sshll.u32 %s4037_s16, 5  ;;  %s727_s18 = scalar_lea.vmem [#allocation14], %s4037_s16 }
 0x194   : > { %s733_s23 = scalar_lea.sflag [#allocation16], %s4034_s22  ;;  %s4065_s1 = scalar_lea.vmem [#allocation15], %s2517_s24 }
 0x195   : > { %3413 = dma.done.wait (%p4421_p7), %s733_s23, 528  }
 0x196   : > { %3415 = vsyncadd (%p4421_p7), %s733_s23, 4294966768  ;;  %s750_s25 = scalar_lea.sflag [#allocation19], %s4034_s22  ;;  %s752_s19 = scalar_lea.vmem [#allocation18], %s4037_s16 }
 0x197   : > { %3417 = dma.done.wait (%p4421_p7), %s750_s25, 32  }
 0x198   : > { %3419 = vsyncadd (%p4421_p7), %s750_s25, 4294967264  ;;  %s760_s7 = scalar_lea.vmem [#allocation20], %s4037_s16  ;;  %s766_s27 = scalar_lea.sflag [#allocation22], %s4034_s22 }
 0x199   : > { %s768_s24 = scalar_lea.vmem [#allocation21], %s4037_s16 }
 0x19a   : > { %3421 = dma.done.wait (%p4421_p7), %s766_s27, 32  }
 0x19b   : > { %3423 = vsyncadd (%p4421_p7), %s766_s27, 4294967264  ;;  %s776_s23 = scalar_lea.vmem [#allocation23], %s4037_s16  ;;  %s4422_s21 = sld [smem:[#allocation34_spill]] }
 0x1a1   : > { %p2518_p5 = scmp.ne.s32.totalorder %s4422_s21, 0 }
 0x1a2   : > { %v868_v0 = vld [vmem:[#allocation3] sm:$0xff] (!%p2518_p5)  ;;  %vm870_vm0 = vcmask (!%p2518_p5), 261120   ;;  %v869_v1 = vld [vmem:[#allocation3 + $0x8] sm:$0xff] (!%p2518_p5) }
 0x1a3   : > { %867 = sbr.rel (%p2518_p5) target bundleno = 426 (0x1aa), region = 128  ;;  %871 = vst.msk [vmem:[#allocation2] sm:$0xff] (!%p2518_p5), %vm870_vm0, %v868_v0  ;;  %872 = vst.msk [vmem:[#allocation2 + $0x8] sm:$0xff] (!%p2518_p5), %vm870_vm0, %v869_v1 }
 0x1aa PF: > { %v2908_v2 = vld [vmem:[%s685_s5] sm:$0xff]   ;;  %v3469_v3 = vmov 0.0   ;;  %v2909_v4 = vld [vmem:[%s685_s5 + $0x8] sm:$0xff]   ;;  %vm3470_vm1 = vmmov 0   ;;  %vm899_vm2 = vcmask 261120   ;;  %s3471_s12 = smov 96  }
 0x1ab   : > { %2612 = vmatprep.subr.bf16.mxu0 %v3469_v3  ;;  %2620 = vmatprep.subr.bf16.mxu1 %v3469_v3  ;;  %v4095_v5 = vld [vmem:[#allocation2] sm:$0xff]  ;;  %v4097_v6 = vld [vmem:[#allocation2 + $0x8] sm:$0xff]  ;;  %vm949_vm3 = vcmask 64512   ;;  %s3472_s22 = smov 64   ;;  %s3473_s5 = smov 88   ;;  %vm1076_vm4 = vcmask 1043456  }
 0x1ac   : > { %2613 = vmatpush3.bf16.msra.mxu0 %v2908_v2  ;;  %2616 = vmatprep.mubr.msk.bf16.mxu0 %vm3470_vm1, %v3469_v3  ;;  %v875_v7 = vpack.c.bf16 %v4097_v6, %v4095_v5  ;;  %v2519_v8 = vld [vmem:[%s693_s20] ss:$0 sm:$0xff]  ;;  %s3474_s20 = smov 120   ;;  %s3475_s21 = smov 56   ;;  %vm1860_vm5 = vcmask 130048   ;;  %vm1863_vm6 = vcmask 195584  }
 0x1ad   : > { %2614 = vmatprep.subr.bf16.mxu0 %v3469_v3  ;;  %2622 = vmatprep.mubr.msk.bf16.mxu1 %vm3470_vm1, %v3469_v3  ;;  %s3476_s25 = smov 80   ;;  %s3477_s27 = smov 112   ;;  %vm2091_vm7 = vcmask 523264  }
 0x1ae   : > { %s4423_s17 = scalar_lea.vmem [#allocation17], %s4037_s16 }
 0x1b0   : > { %2615 = vmatpush3.bf16.msra.mxu0 %v2909_v4 }
 0x1b1   : > { %2626 = vmatprep.subr.bf16.mxu0 %v3469_v3 }
 0x1b3   : > { %2617 = vmatmul.mubr.msk.bf16.vlgmr.msra.gmra.mrb[0].mxu0 %vm899_vm2, %v875_v7 }
 0x1b4   : > { %2628 = vmatprep.mubr.msk.bf16.mxu0 %vm3470_vm1, %v3469_v3 }
 0x286   : > { %v937_v9 = vpop.f32.mrb[0].mxu0 }
 0x287   : > { %v938_v10 = vadd.f32 %v2519_v8, %v937_v9  ;;  %v2618_v11 = vpop.f32.mrb[1].mxu0 }
 0x288   : > { %v940_v12 = vpop.f32.mrb[2].mxu0 }
 0x289   : > { %v4110_v13 = vpack.c.bf16 %v938_v10, %v938_v10  ;;  %v941_v14 = vadd.f32 %v2519_v8, %v940_v12  ;;  %v2619_v15 = vpop.f32.mrb[3].mxu0 }
 0x28b   : > { %947 = vrot.lane.b32.xlu0 %v4110_v13, %s3471_s12  ;;  %v4113_v16 = vpack.c.bf16 %v941_v14, %v941_v14 }
 0x28f   : > { %997 = vrot.lane.b32.xlu0 %v4113_v16, %s3471_s12  ;;  %s3478_s12 = smov 48  }
 0x2fd   : > { %v948_v17 = vpop.permute.xlu0 %947 }
 0x2fe   : > { %v954_v18 = vsel %vm949_vm3, %v948_v17, 0 }
 0x2ff   : > { %2621 = vmatpush3.bf16.xpose.msra.mxu1 %v954_v18 }
 0x300   : > { %2632 = vmatprep.subr.bf16.mxu1 %v3469_v3 }
 0x301   : > { %v998_v19 = vpop.permute.xlu0 %997 }
 0x302   : > { %v1003_v20 = vsel %vm949_vm3, %v998_v19, 0 }
 0x303   : > { %2627 = vmatpush3.bf16.xpose.msra.mxu0 %v1003_v20 }
 0x304   : > { %2638 = vmatprep.subr.bf16.mxu0 %v3469_v3 }
 0x306   : > { %2623 = vmatmul.mubr.msk.bf16.vlgmr.msra.gmra.mrb[0].mxu1 %vm949_vm3, %v4110_v13 }
 0x307   : > { %2634 = vmatprep.mubr.msk.bf16.mxu1 %vm3470_vm1, %v3469_v3 }
 0x30a   : > { %2629 = vmatmul.mubr.msk.bf16.vlgmr.msra.gmra.mrb[4].mxu0 %vm949_vm3, %v4113_v16 }
 0x30b   : > { %2640 = vmatprep.mubr.msk.bf16.mxu0 %vm3470_vm1, %v3469_v3 }
 0x3d9   : > { %v990_v21 = vpop.f32.mrb[0].mxu1 }
 0x3da   : > { %v1045_v22 = vmul.f32 0.35355338, %v990_v21  ;;  %v2624_v23 = vpop.f32.mrb[1].mxu1 }
 0x3db   : > { %v993_v24 = vpop.f32.mrb[2].mxu1 }
 0x3dc   : > { %v2625_v25 = vpop.f32.mrb[3].mxu1  ;;  %v1047_v26 = vsel %vm949_vm3, %v1045_v22, -inf }
 0x3dd   : > { %1048 = vmax.xlane.f32.xlu1 %v1047_v26  ;;  %v1039_v27 = vpop.f32.mrb[4].mxu0 }
 0x3de   : > { %v1046_v28 = vmul.f32 0.35355338, %v1039_v27  ;;  %v2630_v29 = vpop.f32.mrb[5].mxu0 }
 0x3df   : > { %v1042_v30 = vpop.f32.mrb[6].mxu0 }
 0x3e0   : > { %v2631_v31 = vpop.f32.mrb[7].mxu0  ;;  %v1050_v32 = vsel %vm949_vm3, %v1046_v28, -inf }
 0x3e1   : > { %1051 = vmax.xlane.f32.xlu1 %v1050_v32 }
 0x3f2   : > { %1071 = vrot.lane.b32.xlu1 %v4110_v13, %s3472_s22 }
 0x3f6   : > { %1120 = vrot.lane.b32.xlu1 %v4113_v16, %s3472_s22  ;;  %s3479_s22 = smov 72  }
 0x3fa   : > { %1170 = vrot.lane.b32.xlu1 %v4110_v13, %s3473_s5 }
 0x46a   : > { %v1049_v33 = vpop.xlane.xlu1 %1048 }
 0x46b   : > { %v1053_v34 = vsub.f32 %v1045_v22, %v1049_v33 }
 0x46d   : > { %v1055_v35 = vmul.f32 1.442695, %v1053_v34 }
 0x46e   : > { %v1052_v36 = vpop.xlane.xlu1 %1051 }
 0x46f   : > { %2918 = vpow2.f32 %v1055_v35  ;;  %v1054_v37 = vsub.f32 %v1046_v28, %v1052_v36 }
 0x471   : > { %v1057_v38 = vmul.f32 1.442695, %v1054_v37 }
 0x472   : > { %v1072_v39 = vpop.permute.xlu1 %1071 }
 0x473   : > { %2920 = vpow2.f32 %v1057_v38  ;;  %v1078_v40 = vsel %vm1076_vm4, %v1072_v39, 0 }
 0x474   : > { %2633 = vmatpush3.bf16.msra.mxu1 %v1078_v40 }
 0x475   : > { %2644 = vmatprep.subr.bf16.mxu1 %v3469_v3 }
 0x476   : > { %v1121_v41 = vpop.permute.xlu1 %1120 }
 0x477   : > { %v1126_v42 = vsel %vm1076_vm4, %v1121_v41, 0 }
 0x478   : > { %2639 = vmatpush3.bf16.msra.mxu0 %v1126_v42 }
 0x479   : > { %v2919_v43 = vpop.eup %2918  ;;  %2650 = vmatprep.subr.bf16.mxu0 %v3469_v3 }
 0x47a   : > { %v1059_v44 = vsel %vm949_vm3, %v2919_v43, 0.0  ;;  %v1171_v47 = vpop.permute.xlu1 %1170 }
 0x47b   : > { %1060 = vadd.xlane.f32.xlu0 %v1059_v44  ;;  %v1176_v54 = vsel %vm949_vm3, %v1171_v47, 0 }
 0x47d   : > { %v2921_v45 = vpop.eup %2920 }
 0x47e   : > { %v1062_v46 = vsel %vm949_vm3, %v2921_v45, 0.0 }
 0x47f   : > { %1063 = vadd.xlane.f32.xlu1 %v1062_v46 }
 0x490   : > { %1220 = vrot.lane.b32.xlu1 %v4113_v16, %s3473_s5  ;;  %s3480_s5 = smov 104  }
 0x491   : > { %1168 = vrot.lane.b32.xlu0 %v4110_v13, %s3474_s20 }
 0x494   : > { %1218 = vrot.lane.b32.xlu1 %v4113_v16, %s3474_s20  ;;  %s3481_s20 = smov 40  }
 0x508   : > { %v1061_v48 = vpop.xlane.xlu0 %1060 }
 0x509   : > { %2922 = vrcp.f32 %v1061_v48 }
 0x50c   : > { %v1064_v49 = vpop.xlane.xlu1 %1063  ;;  %v1169_v59 = vpop.permute.xlu0 %1168 }
 0x50d   : > { %2924 = vrcp.f32 %v1064_v49 }
 0x510   : > { %v1221_v56 = vpop.permute.xlu1 %1220 }
 0x511   : > { %v1226_v58 = vsel %vm949_vm3, %v1221_v56, 0 }
 0x513   : > { %v2923_v50 = vpop.eup %2922 }
 0x514   : > { %v1067_v51 = vmul.f32 %v2923_v50, %v2919_v43  ;;  %v1219_v60 = vpop.permute.xlu1 %1218 }
 0x516   : > { %v1069_v52 = vpack.c.bf16 %v1067_v51, %v1067_v51 }
 0x517   : > { %v2925_v53 = vpop.eup %2924 }
 0x518   : > { %v1068_v55 = vmul.f32 %v2925_v53, %v2921_v45  ;;  %2635 = vmatmul.mubr.msk.bf16.vlgmr.msra.gmra.mrb[4].mxu1 %vm949_vm3, %v1069_v52 }
 0x519   : > { %2645 = vmatpush3.bf16.xpose.msra.mxu1 %v1176_v54  ;;  %2646 = vmatprep.mubr.msk.bf16.mxu1 %vm3470_vm1, %v3469_v3 }
 0x51a   : > { %v1070_v57 = vpack.c.bf16 %v1068_v55, %v1068_v55  ;;  %2656 = vmatprep.subr.bf16.mxu1 %v3469_v3 }
 0x51c   : > { %2641 = vmatmul.mubr.msk.bf16.vlgmr.msra.gmra.mrb[8].mxu0 %vm949_vm3, %v1070_v57 }
 0x51d   : > { %2651 = vmatpush3.bf16.xpose.msra.mxu0 %v1226_v58  ;;  %2652 = vmatprep.mubr.msk.bf16.mxu0 %vm3470_vm1, %v3469_v3 }
 0x51e   : > { %2662 = vmatprep.subr.bf16.mxu0 %v3469_v3 }
 0x520   : > { %2647 = vmatmul.mubr.msk.bf16.vlgmr.msra.gmra.mrb[8].mxu1 %vm949_vm3, %v1169_v59 }
 0x521   : > { %2658 = vmatprep.mubr.msk.bf16.mxu1 %vm3470_vm1, %v3469_v3 }
 0x524   : > { %2653 = vmatmul.mubr.msk.bf16.vlgmr.msra.gmra.mrb[12].mxu0 %vm949_vm3, %v1219_v60 }
 0x525   : > { %2664 = vmatprep.mubr.msk.bf16.mxu0 %vm3470_vm1, %v3469_v3 }
 0x5eb   : > { %v4158_v61 = vpop.f32.mrb[4].mxu1 }
 0x5ec   : > { %v2636_v62 = vpop.f32.mrb[5].mxu1 }
 0x5ed   : > { %v1117_v63 = vpop.f32.mrb[6].mxu1 }
 0x5ee   : > { %v2637_v0 = vpop.f32.mrb[7].mxu1 }
 0x5ef   : > { %v4160_v1 = vpop.f32.mrb[8].mxu0 }
 0x5f0   : > { %v2642_v2 = vpop.f32.mrb[9].mxu0 }
 0x5f1   : > { %v1165_v4 = vpop.f32.mrb[10].mxu0 }
 0x5f2   : > { %v2643_v7 = vpop.f32.mrb[11].mxu0 }
 0x5f3   : > { %v1212_v8 = vpop.f32.mrb[8].mxu1 }
 0x5f4   : > { %v1268_v9 = vmul.f32 0.35355338, %v1212_v8  ;;  %v2648_v10 = vpop.f32.mrb[9].mxu1 }
 0x5f5   : > { %v1215_v11 = vpop.f32.mrb[10].mxu1 }
 0x5f6   : > { %v2649_v12 = vpop.f32.mrb[11].mxu1  ;;  %v1270_v14 = vsel %vm949_vm3, %v1268_v9, -inf }
 0x5f7   : > { %1271 = vmax.xlane.f32.xlu1 %v1270_v14  ;;  %v1262_v15 = vpop.f32.mrb[12].mxu0 }
 0x5f8   : > { %v1269_v17 = vmul.f32 0.35355338, %v1262_v15  ;;  %v2654_v18 = vpop.f32.mrb[13].mxu0 }
 0x5f9   : > { %v1265_v19 = vpop.f32.mrb[14].mxu0 }
 0x5fa   : > { %v2655_v20 = vpop.f32.mrb[15].mxu0  ;;  %v1273_v21 = vsel %vm949_vm3, %v1269_v17, -inf }
 0x5fb   : > { %1274 = vmax.xlane.f32.xlu0 %v1273_v21 }
 0x608   : > { %1294 = vrot.lane.b32.xlu1 %v4110_v13, %s3475_s21 }
 0x60c   : > { %1392 = vrot.lane.b32.xlu1 %v4110_v13, %s3476_s25 }
 0x611   : > { %1342 = vrot.lane.b32.xlu0 %v4113_v16, %s3475_s21  ;;  %s3482_s21 = smov 8  }
 0x615   : > { %1390 = vrot.lane.b32.xlu0 %v4110_v13, %s3477_s27 }
 0x684   : > { %v1272_v22 = vpop.xlane.xlu1 %1271 }
 0x685   : > { %v1276_v23 = vsub.f32 %v1268_v9, %v1272_v22 }
 0x687   : > { %v1278_v24 = vmul.f32 1.442695, %v1276_v23 }
 0x688   : > { %v1295_v25 = vpop.permute.xlu1 %1294  ;;  %v1275_v26 = vpop.xlane.xlu0 %1274 }
 0x689   : > { %2926 = vpow2.f32 %v1278_v24  ;;  %v1300_v27 = vsel %vm1076_vm4, %v1295_v25, 0  ;;  %v1277_v28 = vsub.f32 %v1269_v17, %v1275_v26 }
 0x68a   : > { %2657 = vmatpush3.bf16.msra.mxu1 %v1300_v27 }
 0x68b   : > { %v1280_v29 = vmul.f32 1.442695, %v1277_v28  ;;  %2668 = vmatprep.subr.bf16.mxu1 %v3469_v3 }
 0x68c   : > { %v1343_v30 = vpop.permute.xlu0 %1342  ;;  %v1393_v36 = vpop.permute.xlu1 %1392 }
 0x68d   : > { %2928 = vpow2.f32 %v1280_v29  ;;  %v1348_v31 = vsel %vm1076_vm4, %v1343_v30, 0  ;;  %v1398_v43 = vsel %vm949_vm3, %v1393_v36, 0 }
 0x68e   : > { %2663 = vmatpush3.bf16.msra.mxu0 %v1348_v31 }
 0x68f   : > { %2674 = vmatprep.subr.bf16.mxu0 %v3469_v3 }
 0x690   : > { %v1391_v48 = vpop.permute.xlu0 %1390 }
 0x693   : > { %v2927_v32 = vpop.eup %2926 }
 0x694   : > { %v1282_v33 = vsel %vm949_vm3, %v2927_v32, 0.0 }
 0x695   : > { %1283 = vadd.xlane.f32.xlu1 %v1282_v33 }
 0x697   : > { %v2929_v34 = vpop.eup %2928 }
 0x698   : > { %v1285_v35 = vsel %vm949_vm3, %v2929_v34, 0.0 }
 0x699   : > { %1286 = vadd.xlane.f32.xlu1 %v1285_v35 }
 0x6aa   : > { %1442 = vrot.lane.b32.xlu1 %v4113_v16, %s3476_s25  ;;  %s3483_s25 = smov 16  }
 0x6ae   : > { %1440 = vrot.lane.b32.xlu1 %v4113_v16, %s3477_s27  ;;  %s3484_s27 = smov 24  }
 0x722   : > { %v1284_v37 = vpop.xlane.xlu1 %1283 }
 0x723   : > { %2930 = vrcp.f32 %v1284_v37 }
 0x726   : > { %v1287_v38 = vpop.xlane.xlu1 %1286 }
 0x727   : > { %2932 = vrcp.f32 %v1287_v38 }
 0x72a   : > { %v1443_v45 = vpop.permute.xlu1 %1442 }
 0x72b   : > { %v1448_v47 = vsel %vm949_vm3, %v1443_v45, 0 }
 0x72d   : > { %v2931_v39 = vpop.eup %2930 }
 0x72e   : > { %v1290_v40 = vmul.f32 %v2931_v39, %v2927_v32  ;;  %v1441_v49 = vpop.permute.xlu1 %1440 }
 0x730   : > { %v1292_v41 = vpack.c.bf16 %v1290_v40, %v1290_v40 }
 0x731   : > { %v2933_v42 = vpop.eup %2932 }
 0x732   : > { %v1291_v44 = vmul.f32 %v2933_v42, %v2929_v34  ;;  %2659 = vmatmul.mubr.msk.bf16.vlgmr.msra.gmra.mrb[12].mxu1 %vm949_vm3, %v1292_v41 }
 0x733   : > { %2669 = vmatpush3.bf16.xpose.msra.mxu1 %v1398_v43  ;;  %2670 = vmatprep.mubr.msk.bf16.mxu1 %vm3470_vm1, %v3469_v3 }
 0x734   : > { %v1293_v46 = vpack.c.bf16 %v1291_v44, %v1291_v44  ;;  %2680 = vmatprep.subr.bf16.mxu1 %v3469_v3 }
 0x736   : > { %2665 = vmatmul.mubr.msk.bf16.vlgmr.msra.gmra.mrb[16].mxu0 %vm949_vm3, %v1293_v46 }
 0x737   : > { %2675 = vmatpush3.bf16.xpose.msra.mxu0 %v1448_v47  ;;  %2676 = vmatprep.mubr.msk.bf16.mxu0 %vm3470_vm1, %v3469_v3 }
 0x738   : > { %2686 = vmatprep.subr.bf16.mxu0 %v3469_v3 }
 0x73a   : > { %2671 = vmatmul.mubr.msk.bf16.vlgmr.msra.gmra.mrb[16].mxu1 %vm949_vm3, %v1391_v48 }
 0x73b   : > { %2682 = vmatprep.mubr.msk.bf16.mxu1 %vm3470_vm1, %v3469_v3 }
 0x73e   : > { %2677 = vmatmul.mubr.msk.bf16.vlgmr.msra.gmra.mrb[20].mxu0 %vm949_vm3, %v1441_v49 }
 0x73f   : > { %2688 = vmatprep.mubr.msk.bf16.mxu0 %vm3470_vm1, %v3469_v3 }
 0x805   : > { %v4192_v50 = vpop.f32.mrb[12].mxu1 }
 0x806   : > { %v2660_v51 = vpop.f32.mrb[13].mxu1 }
 0x807   : > { %v1339_v52 = vpop.f32.mrb[14].mxu1 }
 0x808   : > { %v2661_v53 = vpop.f32.mrb[15].mxu1 }
 0x809   : > { %v4194_v54 = vpop.f32.mrb[16].mxu0 }
 0x80a   : > { %v2893_v55 = vpack.i.bf16 %v4194_v54, %v4192_v50  ;;  %v2666_v56 = vpop.f32.mrb[17].mxu0 }
 0x80b   : > { %v1387_v57 = vpop.f32.mrb[18].mxu0 }
 0x80c   : > { %v2667_v58 = vpop.f32.mrb[19].mxu0 }
 0x80d   : > { %v1434_v59 = vpop.f32.mrb[16].mxu1 }
 0x80e   : > { %v1490_v60 = vmul.f32 0.35355338, %v1434_v59  ;;  %v2672_v62 = vpop.f32.mrb[17].mxu1 }
 0x80f   : > { %v1437_v63 = vpop.f32.mrb[18].mxu1 }
 0x810   : > { %v2673_v0 = vpop.f32.mrb[19].mxu1  ;;  %v1492_v2 = vsel %vm949_vm3, %v1490_v60, -inf }
 0x811   : > { %1493 = vmax.xlane.f32.xlu0 %v1492_v2  ;;  %v1484_v4 = vpop.f32.mrb[20].mxu0 }
 0x812   : > { %v1491_v7 = vmul.f32 0.35355338, %v1484_v4  ;;  %v2678_v8 = vpop.f32.mrb[21].mxu0 }
 0x813   : > { %v1487_v9 = vpop.f32.mrb[22].mxu0 }
 0x814   : > { %v2679_v10 = vpop.f32.mrb[23].mxu0  ;;  %v1495_v11 = vsel %vm949_vm3, %v1491_v7, -inf }
 0x815   : > { %1496 = vmax.xlane.f32.xlu1 %v1495_v11 }
 0x826   : > { %1516 = vrot.lane.b32.xlu1 %v4110_v13, %s3478_s12 }
 0x82a   : > { %1614 = vrot.lane.b32.xlu1 %v4110_v13, %s3479_s22 }
 0x82e   : > { %1664 = vrot.lane.b32.xlu1 %v4113_v16, %s3479_s22 }
 0x832   : > { %1662 = vrot.lane.b32.xlu1 %v4113_v16, %s3480_s5 }
 0x89e   : > { %v1494_v12 = vpop.xlane.xlu0 %1493 }
 0x89f   : > { %v1498_v14 = vsub.f32 %v1490_v60, %v1494_v12 }
 0x8a1   : > { %v1500_v15 = vmul.f32 1.442695, %v1498_v14 }
 0x8a2   : > { %v1497_v17 = vpop.xlane.xlu1 %1496 }
 0x8a3   : > { %2934 = vpow2.f32 %v1500_v15  ;;  %v1499_v18 = vsub.f32 %v1491_v7, %v1497_v17 }
 0x8a5   : > { %v1502_v19 = vmul.f32 1.442695, %v1499_v18 }
 0x8a6   : > { %v1517_v20 = vpop.permute.xlu1 %1516 }
 0x8a7   : > { %2936 = vpow2.f32 %v1502_v19  ;;  %v1522_v21 = vsel %vm1076_vm4, %v1517_v20, 0 }
 0x8a8   : > { %2681 = vmatpush3.bf16.msra.mxu1 %v1522_v21 }
 0x8a9   : > { %2692 = vmatprep.subr.bf16.mxu1 %v3469_v3 }
 0x8aa   : > { %v1615_v31 = vpop.permute.xlu1 %1614 }
 0x8ab   : > { %v1620_v35 = vsel %vm949_vm3, %v1615_v31, 0 }
 0x8ad   : > { %v2935_v22 = vpop.eup %2934 }
 0x8ae   : > { %v1504_v23 = vsel %vm949_vm3, %v2935_v22, 0.0  ;;  %v1665_v37 = vpop.permute.xlu1 %1664 }
 0x8af   : > { %1505 = vadd.xlane.f32.xlu0 %v1504_v23  ;;  %v1670_v39 = vsel %vm949_vm3, %v1665_v37, 0 }
 0x8b1   : > { %v2937_v24 = vpop.eup %2936 }
 0x8b2   : > { %v1507_v25 = vsel %vm949_vm3, %v2937_v24, 0.0  ;;  %v1663_v41 = vpop.permute.xlu1 %1662 }
 0x8b3   : > { %1508 = vadd.xlane.f32.xlu0 %v1507_v25 }
 0x8c9   : > { %1564 = vrot.lane.b32.xlu0 %v4113_v16, %s3478_s12 }
 0x8cd   : > { %1612 = vrot.lane.b32.xlu0 %v4110_v13, %s3480_s5 }
 0x93c   : > { %v1506_v26 = vpop.xlane.xlu0 %1505 }
 0x93d   : > { %2938 = vrcp.f32 %v1506_v26  ;;  %v2910_v26 = vld [vmem:[%s702_s15] sm:$0xff]  }
 0x940   : > { %v1509_v27 = vpop.xlane.xlu0 %1508 }
 0x941   : > { %2940 = vrcp.f32 %v1509_v27  ;;  %v2911_v27 = vld [vmem:[%s702_s15 + $0x8] sm:$0xff]   ;;  %s4424_s15 = sld [smem:[#allocation34_spill]] }
 0x944   : > { %v1565_v28 = vpop.permute.xlu0 %1564 }
 0x945   : > { %v1570_v29 = vsel %vm1076_vm4, %v1565_v28, 0 }
 0x946   : > { %2687 = vmatpush3.bf16.msra.mxu0 %v1570_v29 }
 0x947   : > { %v2939_v30 = vpop.eup %2938  ;;  %2698 = vmatprep.subr.bf16.mxu0 %v3469_v3  ;;  %p2557_p13 = scmp.ne.s32.totalorder %s4424_s15, 1 }
 0x948   : > { %v1512_v32 = vmul.f32 %v2939_v30, %v2935_v22  ;;  %v1613_v40 = vpop.permute.xlu0 %1612 }
 0x94a   : > { %v1514_v33 = vpack.c.bf16 %v1512_v32, %v1512_v32 }
 0x94b   : > { %v2941_v34 = vpop.eup %2940 }
 0x94c   : > { %v1513_v36 = vmul.f32 %v2941_v34, %v2937_v24  ;;  %2683 = vmatmul.mubr.msk.bf16.vlgmr.msra.gmra.mrb[20].mxu1 %vm949_vm3, %v1514_v33 }
 0x94d   : > { %2693 = vmatpush3.bf16.xpose.msra.mxu1 %v1620_v35  ;;  %2694 = vmatprep.mubr.msk.bf16.mxu1 %vm3470_vm1, %v3469_v3 }
 0x94e   : > { %v1515_v38 = vpack.c.bf16 %v1513_v36, %v1513_v36  ;;  %2704 = vmatprep.subr.bf16.mxu1 %v3469_v3 }
 0x950   : > { %2689 = vmatmul.mubr.msk.bf16.vlgmr.msra.gmra.mrb[24].mxu0 %vm949_vm3, %v1515_v38 }
 0x951   : > { %2699 = vmatpush3.bf16.xpose.msra.mxu0 %v1670_v39  ;;  %2700 = vmatprep.mubr.msk.bf16.mxu0 %vm3470_vm1, %v3469_v3 }
 0x952   : > { %2710 = vmatprep.subr.bf16.mxu0 %v3469_v3 }
 0x954   : > { %2695 = vmatmul.mubr.msk.bf16.vlgmr.msra.gmra.mrb[24].mxu1 %vm949_vm3, %v1613_v40 }
 0x955   : > { %2706 = vmatprep.mubr.msk.bf16.mxu1 %vm3470_vm1, %v3469_v3 }
 0x958   : > { %2701 = vmatmul.mubr.msk.bf16.vlgmr.msra.gmra.mrb[28].mxu0 %vm949_vm3, %v1663_v41 }
 0x959   : > { %2712 = vmatprep.mubr.msk.bf16.mxu0 %vm3470_vm1, %v3469_v3 }
 0xa1f   : > { %v1558_v42 = vpop.f32.mrb[20].mxu1 }
 0xa20   : > { %v2684_v43 = vpop.f32.mrb[21].mxu1 }
 0xa21   : > { %v1561_v44 = vpop.f32.mrb[22].mxu1 }
 0xa22   : > { %v2685_v45 = vpop.f32.mrb[23].mxu1 }
 0xa23   : > { %v1606_v46 = vpop.f32.mrb[24].mxu0 }
 0xa24   : > { %v2898_v47 = vpack.i.bf16 %v1606_v46, %v1558_v42  ;;  %v2690_v48 = vpop.f32.mrb[25].mxu0 }
 0xa25   : > { %v1609_v49 = vpop.f32.mrb[26].mxu0 }
 0xa26   : > { %v2691_v51 = vpop.f32.mrb[27].mxu0 }
 0xa27   : > { %v1656_v52 = vpop.f32.mrb[24].mxu1 }
 0xa28   : > { %v1712_v53 = vmul.f32 0.35355338, %v1656_v52  ;;  %v2696_v56 = vpop.f32.mrb[25].mxu1 }
 0xa29   : > { %v1659_v57 = vpop.f32.mrb[26].mxu1  ;;  %v2539_v56 = vld [vmem:[%s710_s13] ss:$0 sm:$0xff] }
 0xa2a   : > { %v2697_v58 = vpop.f32.mrb[27].mxu1  ;;  %v1714_v59 = vsel %vm949_vm3, %v1712_v53, -inf }
 0xa2b   : > { %1715 = vmax.xlane.f32.xlu0 %v1714_v59  ;;  %v1706_v60 = vpop.f32.mrb[28].mxu0 }
 0xa2c   : > { %v1713_v62 = vmul.f32 0.35355338, %v1706_v60  ;;  %v2702_v63 = vpop.f32.mrb[29].mxu0 }
 0xa2d   : > { %v1709_v0 = vpop.f32.mrb[30].mxu0 }
 0xa2e   : > { %v2703_v2 = vpop.f32.mrb[31].mxu0  ;;  %v1717_v4 = vsel %vm949_vm3, %v1713_v62, -inf }
 0xa2f   : > { %1718 = vmax.xlane.f32.xlu1 %v1717_v4 }
 0xa40   : > { %1738 = vrot.lane.b32.xlu1 %v4110_v13, %s3481_s20 }
 0xa44   : > { %2894 = vrot.lane.b32.xlu1 %v2893_v55, %s3482_s21 }
 0xa48   : > { %2899 = vrot.lane.b32.xlu1 %v2898_v47, %s3483_s25 }
 0xab8   : > { %v1716_v7 = vpop.xlane.xlu0 %1715 }
 0xab9   : > { %v1720_v8 = vsub.f32 %v1712_v53, %v1716_v7 }
 0xabb   : > { %v1722_v9 = vmul.f32 1.442695, %v1720_v8 }
 0xabc   : > { %v1719_v10 = vpop.xlane.xlu1 %1718 }
 0xabd   : > { %2942 = vpow2.f32 %v1722_v9  ;;  %v1721_v11 = vsub.f32 %v1713_v62, %v1719_v10 }
 0xabf   : > { %v1724_v12 = vmul.f32 1.442695, %v1721_v11 }
 0xac0   : > { %v1739_v14 = vpop.permute.xlu1 %1738 }
 0xac1   : > { %2944 = vpow2.f32 %v1724_v12  ;;  %v1744_v15 = vsel %vm1076_vm4, %v1739_v14, 0 }
 0xac2   : > { %2705 = vmatpush3.bf16.msra.mxu1 %v1744_v15  ;;  %v2912_v15 = vld [vmem:[%s719_s28] sm:$0xff]  }
 0xac3   : > { %2716 = vmatprep.subr.bf16.mxu1 %v3469_v3 }
 0xac4   : > { %v2895_v37 = vpop.permute.xlu1 %2894 }
 0xac5   : > { %v2897_v39 = vunpack.i.h.bf16 %v2895_v37  ;;  %v2896_v40 = vunpack.i.l.bf16 %v2895_v37 }
 0xac7   : > { %v2943_v13 = vpop.eup %2942  ;;  %v1859_v44 = vsel %vm949_vm3, %v4160_v1, %v2897_v39  ;;  %v1858_v45 = vsel %vm949_vm3, %v4158_v61, %v2896_v40 }
 0xac8   : > { %v1726_v50 = vsel %vm949_vm3, %v2943_v13, 0.0  ;;  %v2900_v38 = vpop.permute.xlu1 %2899 }
 0xac9   : > { %1727 = vadd.xlane.f32.xlu0 %v1726_v50  ;;  %v2902_v41 = vunpack.i.h.bf16 %v2900_v38  ;;  %v2901_v42 = vunpack.i.l.bf16 %v2900_v38  ;;  %v2914_v50 = vld [vmem:[%s4065_s1] sm:$0xff]  }
 0xacb   : > { %v2945_v54 = vpop.eup %2944  ;;  %v1861_v48 = vsel %vm1860_vm5, %v1858_v45, %v2901_v42  ;;  %v1862_v49 = vsel %vm1860_vm5, %v1859_v44, %v2902_v41  ;;  %v2549_v44 = vld [vmem:[%s4423_s17] ss:$0 sm:$0xff] }
 0xacc   : > { %v1729_v55 = vsel %vm949_vm3, %v2945_v54, 0.0 }
 0xacd   : > { %1730 = vadd.xlane.f32.xlu0 %v1729_v55 }
 0xae3   : > { %1786 = vrot.lane.b32.xlu0 %v4113_v16, %s3481_s20 }
 0xb56   : > { %v1728_v17 = vpop.xlane.xlu0 %1727 }
 0xb57   : > { %2946 = vrcp.f32 %v1728_v17 }
 0xb5a   : > { %v1731_v18 = vpop.xlane.xlu0 %1730 }
 0xb5b   : > { %2948 = vrcp.f32 %v1731_v18 }
 0xb5e   : > { %v1787_v19 = vpop.permute.xlu0 %1786 }
 0xb5f   : > { %v1792_v20 = vsel %vm1076_vm4, %v1787_v19, 0 }
 0xb60   : > { %2711 = vmatpush3.bf16.msra.mxu0 %v1792_v20 }
 0xb61   : > { %v2947_v21 = vpop.eup %2946  ;;  %2724 = vmatprep.subr.bf16.mxu0 %v3469_v3 }
 0xb62   : > { %v1734_v22 = vmul.f32 %v2947_v21, %v2943_v13  ;;  %v2913_v13 = vld [vmem:[%s719_s28 + $0x8] sm:$0xff]  }
 0xb64   : > { %v1736_v23 = vpack.c.bf16 %v1734_v22, %v1734_v22 }
 0xb65   : > { %v2949_v24 = vpop.eup %2948 }
 0xb66   : > { %v1735_v25 = vmul.f32 %v2949_v24, %v2945_v54  ;;  %2707 = vmatmul.mubr.msk.bf16.vlgmr.msra.gmra.mrb[28].mxu1 %vm949_vm3, %v1736_v23  ;;  %v2915_v54 = vld [vmem:[%s4065_s1 + $0x8] sm:$0xff]   ;;  %v2543_v23 = vld [vmem:[%s752_s19] ss:$0 sm:$0xff] }
 0xb67   : > { %2720 = vmatprep.mubr.msk.bf16.mxu1 %vm3470_vm1, %v3469_v3  ;;  %2717 = vmatpush3.bf16.msra.mxu1 %v2910_v26 }
 0xb68   : > { %v1737_v16 = vpack.c.bf16 %v1735_v25, %v1735_v25  ;;  %2718 = vmatprep.subr.bf16.mxu1 %v3469_v3 }
 0xb6a   : > { %2713 = vmatmul.mubr.msk.bf16.vlgmr.msra.gmra.mrb[32].mxu0 %vm949_vm3, %v1737_v16 }
 0xb6b   : > { %2728 = vmatprep.mubr.msk.bf16.mxu0 %vm3470_vm1, %v3469_v3  ;;  %2719 = vmatpush3.bf16.msra.mxu1 %v2911_v27  ;;  %v2544_v27 = vld [vmem:[%s760_s7] ss:$0 sm:$0xff] }
 0xb6c   : > { %2732 = vmatprep.subr.bf16.mxu1 %v3469_v3  ;;  %2725 = vmatpush3.bf16.msra.mxu0 %v2912_v15  ;;  %v2556_v15 = vld [vmem:[%s776_s23] ss:$0 sm:$0xff] }
 0xb6d   : > { %2726 = vmatprep.subr.bf16.mxu0 %v3469_v3 }
 0xb70   : > { %2727 = vmatpush3.bf16.msra.mxu0 %v2913_v13 }
 0xc39   : > { %v1780_v28 = vpop.f32.mrb[28].mxu1 }
 0xc3a   : > { %v2708_v29 = vpop.f32.mrb[29].mxu1 }
 0xc3b   : > { %v1783_v30 = vpop.f32.mrb[30].mxu1 }
 0xc3c   : > { %v2709_v31 = vpop.f32.mrb[31].mxu1 }
 0xc3d   : > { %v1828_v32 = vpop.f32.mrb[32].mxu0 }
 0xc3e   : > { %v2903_v33 = vpack.i.bf16 %v1828_v32, %v1780_v28  ;;  %v2714_v34 = vpop.f32.mrb[33].mxu0  ;;  %v2916_v32 = vld [vmem:[%s4065_s1 + $0x10] sm:$0xff]  }
 0xc3f   : > { %v1831_v35 = vpop.f32.mrb[34].mxu0  ;;  %v2545_v34 = vld [vmem:[%s727_s18] ss:$0 sm:$0xff] }
 0xc40   : > { %2904 = vrot.lane.b32.xlu0 %v2903_v33, %s3484_s27  ;;  %v2715_v36 = vpop.f32.mrb[35].mxu0  ;;  %v2917_v33 = vld [vmem:[%s4065_s1 + $0x18] sm:$0xff]  }
 0xcb2   : > { %v2905_v43 = vpop.permute.xlu0 %2904 }
 0xcb3   : > { %v2907_v46 = vunpack.i.h.bf16 %v2905_v43  ;;  %v2906_v47 = vunpack.i.l.bf16 %v2905_v43 }
 0xcb5   : > { %v1865_v51 = vsel %vm1863_vm6, %v1862_v49, %v2907_v46  ;;  %v1864_v52 = vsel %vm1863_vm6, %v1861_v48, %v2906_v47 }
 0xcb6   : > { %v1866_v53 = vpack.c.bf16 %v1865_v51, %v1864_v52 }
 0xcb8   : > { %2721 = vmatmul.mubr.msk.bf16.vlgmr.msra.gmra.mrb[32].mxu1 %vm899_vm2, %v1866_v53 }
 0xcb9   : > { %2740 = vmatprep.mubr.msk.bf16.mxu1 %vm3470_vm1, %v3469_v3  ;;  %2733 = vmatpush3.bf16.msra.mxu1 %v2914_v50 }
 0xcba   : > { %2734 = vmatprep.subr.bf16.mxu1 %v3469_v3 }
 0xcbd   : > { %2735 = vmatpush3.bf16.msra.mxu1 %v2915_v54 }
 0xcbe   : > { %2736 = vmatprep.subr.bf16.mxu1 %v3469_v3 }
 0xcc1   : > { %2737 = vmatpush3.bf16.msra.mxu1 %v2916_v32 }
 0xcc2   : > { %2738 = vmatprep.subr.bf16.mxu1 %v3469_v3 }
 0xcc5   : > { %2739 = vmatpush3.bf16.msra.mxu1 %v2917_v33 }
 0xd8b   : > { %v1927_v57 = vpop.f32.mrb[32].mxu1 }
 0xd8c   : > { %v1928_v58 = vadd.f32 %v2539_v56, %v1927_v57  ;;  %v2722_v1 = vpop.f32.mrb[33].mxu1 }
 0xd8d   : > { %v1930_v59 = vpop.f32.mrb[34].mxu1 }
 0xd8e   : > { %v1931_v60 = vadd.f32 %v2539_v56, %v1930_v59  ;;  %v2723_v61 = vpop.f32.mrb[35].mxu1  ;;  %v1934_v62 = vadd.f32 %v1928_v58, %v4095_v5 }
 0xd90   : > { %v1936_v63 = vsel %vm899_vm2, %v1934_v62, 0.0  ;;  %v1935_v0 = vadd.f32 %v1931_v60, %v4097_v6 }
 0xd91   : > { %1937 = vadd.xlane.f32.xlu1 %v1936_v63 }
 0xd92   : > { %v1939_v2 = vsel %vm899_vm2, %v1935_v0, 0.0 }
 0xd93   : > { %1940 = vadd.xlane.f32.xlu0 %v1939_v2 }
 0xe1e   : > { %v1938_v4 = vpop.xlane.xlu1 %1937 }
 0xe1f   : > { %v1943_v7 = vmul.f32 0.03125, %v1938_v4 }
 0xe20   : > { %v1941_v8 = vpop.xlane.xlu0 %1940 }
 0xe21   : > { %v1945_v9 = vsub.f32 %v1934_v62, %v1943_v7  ;;  %v1944_v10 = vmul.f32 0.03125, %v1941_v8 }
 0xe23   : > { %v1946_v11 = vsub.f32 %v1935_v0, %v1944_v10  ;;  %v1947_v12 = vmul.f32 %v1945_v9, %v1945_v9 }
 0xe25   : > { %v1949_v5 = vsel %vm899_vm2, %v1947_v12, 0.0  ;;  %v1948_v14 = vmul.f32 %v1946_v11, %v1946_v11 }
 0xe26   : > { %1950 = vadd.xlane.f32.xlu0 %v1949_v5  ;;  %v2555_v5 = vld [vmem:[%s768_s24] ss:$0 sm:$0xff] }
 0xe27   : > { %v1952_v6 = vsel %vm899_vm2, %v1948_v14, 0.0 }
 0xe28   : > { %1953 = vadd.xlane.f32.xlu1 %v1952_v6 }
 0xeb3   : > { %v1951_v55 = vpop.xlane.xlu0 %1950 }
 0xeb4   : > { %v1955_v17 = vmul.f32 0.03125, %v1951_v55 }
 0xeb5   : > { %v1954_v18 = vpop.xlane.xlu1 %1953 }
 0xeb6   : > { %v1957_v19 = vadd.f32 1e-05, %v1955_v17  ;;  %v1956_v20 = vmul.f32 0.03125, %v1954_v18 }
 0xeb8   : > { %2950 = vrsqrt.f32 %v1957_v19  ;;  %v1958_v21 = vadd.f32 1e-05, %v1956_v20 }
 0xeba   : > { %2952 = vrsqrt.f32 %v1958_v21 }
 0xec2   : > { %v2951_v22 = vpop.eup %2950 }
 0xec3   : > { %v1961_v24 = vmul.f32 %v2951_v22, %v1945_v9 }
 0xec4   : > { %v2953_v25 = vpop.eup %2952 }
 0xec5   : > { %v1970_v16 = vmul.f32 %v2543_v23, %v1961_v24  ;;  %v1962_v26 = vmul.f32 %v2953_v25, %v1946_v11 }
 0xec7   : > { %v1971_v28 = vmul.f32 %v2543_v23, %v1962_v26  ;;  %v1979_v29 = vadd.f32 %v2544_v27, %v1970_v16 }
 0xec9   : > { %v1980_v30 = vadd.f32 %v2544_v27, %v1971_v28 }
 0xecb   : > { %v1981_v31 = vpack.c.bf16 %v1980_v30, %v1979_v29 }
 0xecd   : > { %2729 = vmatmul.mubr.msk.bf16.vlgmr.msra.gmra.mrb[36].mxu0 %vm899_vm2, %v1981_v31 }
 0xfa0   : > { %v2042_v35 = vpop.f32.mrb[36].mxu0 }
 0xfa1   : > { %v2043_v36 = vadd.f32 %v2545_v34, %v2042_v35  ;;  %v2730_v37 = vpop.f32.mrb[37].mxu0 }
 0xfa2   : > { %v2045_v38 = vpop.f32.mrb[38].mxu0 }
 0xfa3   : > { %v2046_v39 = vadd.f32 %v2545_v34, %v2045_v38  ;;  %v2731_v40 = vpop.f32.mrb[39].mxu0  ;;  %v2049_v41 = vmax.f32 %v2043_v36, 0.0 }
 0xfa5   : > { %v2050_v42 = vmax.f32 %v2046_v39, 0.0 }
 0xfa7   : > { %v2051_v43 = vpack.c.bf16 %v2050_v42, %v2049_v41 }
 0xfa9   : > { %2741 = vmatmul.mubr.msk.bf16.vlgmr.msra.gmra.mrb[36].mxu1 %vm2091_vm7, %v2051_v43 }
0x107c   : > { %v2129_v45 = vpop.f32.mrb[36].mxu1 }
0x107d   : > { %v2130_v46 = vadd.f32 %v2549_v44, %v2129_v45  ;;  %v2742_v3 = vpop.f32.mrb[37].mxu1 }
0x107e   : > { %v2132_v47 = vpop.f32.mrb[38].mxu1 }
0x107f   : > { %v2133_v48 = vadd.f32 %v2549_v44, %v2132_v47  ;;  %v2743_v49 = vpop.f32.mrb[39].mxu1  ;;  %v2136_v51 = vadd.f32 %v2130_v46, %v1979_v29 }
0x1081   : > { %v2138_v52 = vsel %vm899_vm2, %v2136_v51, 0.0  ;;  %v2137_v53 = vadd.f32 %v2133_v48, %v1980_v30 }
0x1082   : > { %2139 = vadd.xlane.f32.xlu0 %v2138_v52 }
0x1083   : > { %v2141_v56 = vsel %vm899_vm2, %v2137_v53, 0.0 }
0x1084   : > { %2142 = vadd.xlane.f32.xlu1 %v2141_v56 }
0x110f   : > { %v2140_v57 = vpop.xlane.xlu0 %2139 }
0x1110   : > { %v2144_v58 = vmul.f32 0.03125, %v2140_v57 }
0x1111   : > { %v2143_v1 = vpop.xlane.xlu1 %2142 }
0x1112   : > { %v2146_v59 = vsub.f32 %v2136_v51, %v2144_v58  ;;  %v2145_v60 = vmul.f32 0.03125, %v2143_v1 }
0x1114   : > { %v2147_v61 = vsub.f32 %v2137_v53, %v2145_v60  ;;  %v2148_v62 = vmul.f32 %v2146_v59, %v2146_v59 }
0x1116   : > { %v2150_v63 = vsel %vm899_vm2, %v2148_v62, 0.0  ;;  %v2149_v0 = vmul.f32 %v2147_v61, %v2147_v61 }
0x1117   : > { %2151 = vadd.xlane.f32.xlu0 %v2150_v63 }
0x1118   : > { %v2153_v2 = vsel %vm899_vm2, %v2149_v0, 0.0 }
0x1119   : > { %2154 = vadd.xlane.f32.xlu1 %v2153_v2 }
0x11a4   : > { %v2152_v4 = vpop.xlane.xlu0 %2151 }
0x11a5   : > { %v2156_v7 = vmul.f32 0.03125, %v2152_v4 }
0x11a6   : > { %v2155_v8 = vpop.xlane.xlu1 %2154 }
0x11a7   : > { %v2158_v9 = vadd.f32 1e-05, %v2156_v7  ;;  %v2157_v10 = vmul.f32 0.03125, %v2155_v8 }
0x11a9   : > { %2954 = vrsqrt.f32 %v2158_v9  ;;  %v2159_v11 = vadd.f32 1e-05, %v2157_v10 }
0x11ab   : > { %2956 = vrsqrt.f32 %v2159_v11 }
0x11b3   : > { %v2955_v12 = vpop.eup %2954 }
0x11b4   : > { %v2162_v14 = vmul.f32 %v2955_v12, %v2146_v59 }
0x11b5   : > { %v2957_v6 = vpop.eup %2956 }
0x11b6   : > { %v2171_v13 = vmul.f32 %v2555_v5, %v2162_v14  ;;  %v2163_v50 = vmul.f32 %v2957_v6, %v2147_v61  ;;  %2187 = sbr.rel (%p2557_p13) target bundleno = 4541 (0x11bd), region = 132 }
0x11b8   : > { %v2180_v54 = vadd.f32 %v2556_v15, %v2171_v13  ;;  %v2172_v55 = vmul.f32 %v2555_v5, %v2163_v50 }
0x11ba   : > { %2182 = vst.msk [vmem:[#allocation2] sm:$0xff] %vm899_vm2, %v2180_v54  ;;  %v2181_v17 = vadd.f32 %v2556_v15, %v2172_v55  ;;  %2188 = vst.msk [vmem:[#allocation24] sm:$0xff] (!%p2557_p13), %vm899_vm2, %v2180_v54 }
0x11bc   : > { %2183 = vst.msk [vmem:[#allocation2 + $0x8] sm:$0xff] %vm899_vm2, %v2181_v17  ;;  %2189 = vst.msk [vmem:[#allocation24 + $0x8] sm:$0xff] (!%p2557_p13), %vm899_vm2, %v2181_v17 }
0x11bd PF: > { %p2820_p0 = scmp.eq.s32.totalorder %s3824_s8, 1  ;;  %s3485_s16 = smov [#allocation24]  }
0x11be   : > { %s2199_s13 = sshll.u32 %s3485_s16, 4  ;;  %s2200_s13 = int_to_ptr.vmem [resolvable:$true] %s2199_s13 }
0x11bf   : > { %s3346_s28 = scalar_lea.vmem %s2200_s13, 256  ;;  %p3353_p1 = scmp.lt.s32.totalorder %s2200_s13, %s2200_s13 }
0x11c0   : > { %p3347_p9 = scmp.ne.s32.totalorder %s2200_s13, %s3346_s28  ;;  %p3354_p8 = scmp.lt.s32.totalorder %s3346_s28, %s3346_s28 }
0x11c2   : > { %p3348_p11 = pnand %p3347_p9, %p2820_p0  ;;  %p3355_p10 = por %p3354_p8, %p3353_p1 }
0x11c4   : > { %p3349_p3 = pneg %p3348_p11 }
0x11c6   : > { %p3356_p12 = pnand %p3355_p10, %p3349_p3 }
0x11c8   : > { %3359 = shalt.err (!%p3356_p12)
}
0x11c9   : > { %s4425_s19 = sld [smem:[#allocation44_spill]] }
0x11cf   : > { %s3360_s7 = scalar_lea.hbm %s4425_s19, 256 }
0x11d0   : > { %p3361_p2 = scmp.ne.s32.totalorder %s4425_s19, %s3360_s7  ;;  %p3366_p7 = scmp.lt.u32.totalorder %s3360_s7, %s4425_s19 }
0x11d2   : > { %p3362_p6 = pnand %p3361_p2, %p2820_p0 }
0x11d4   : > { %p3363_p4 = pneg %p3362_p6 }
0x11d6   : > { %p3368_p5 = pnand %p3366_p7, %p3363_p4 }
0x11d8   : > { %3371 = shalt.err (!%p3368_p5)
}
0x11d9   : > { %s3486_s5 = smov 128  }
0x11da   : > { %2773 = dma.vmem_to_hbm [thread:$0]  (%p2820_p0), %s2200_s13, 256, %s4425_s19, [#allocation5], %s3486_s5, %s3486_s5, %s3482_s21  }
0x11db   : > { %3425 = dma.done.wait (%p2820_p0), [#allocation5], 256  }
0x11dc   : > { %3427 = vsyncadd (%p2820_p0), [#allocation5], 4294967040 }
0x11dd PF: > { %s43_s30 = sadd.s32 1, %s3450_s30   ;;  %s4426_s27 = sld [smem:[#allocation33_spill]] }
0x11de   : > { %p40_p13 = scmp.ge.s32.totalorder %s43_s30, 4   ;;  %s4427_s17 = sld [smem:[#allocation36_spill]] }
0x11df   : > { %s4428_s15 = sld [smem:[#allocation35_spill]]  ;;  %s4429_s25 = smov %s3434_s26 }
0x11e0   : > { %s4432_s28 = smov %s3446_s29  ;;  %42 = sbr.rel (!%p40_p13) target bundleno = 25 (0x19), region = 255 }
0x11e3   : > { %s4430_s26 = smov %s4426_s27 }
0x11e4   : > { %s4431_s27 = smov %s4427_s17 }
0x11e5   : > { %s4433_s29 = smov %s4428_s15 }
0x11e7   :  { %2215 = vsyncpa [#allocation4], 1 }
0x11e8   :  { %2217 = vsyncpa [#allocation4 + $0x1], 1 }
0x11e9   :  { %2218 = vsyncpa [#allocation7], 1 }
0x11ea   :  { %2220 = vsyncpa [#allocation7 + $0x1], 1 }
0x11eb   :  { %2221 = vsyncpa [#allocation10], 1 }
0x11ec   :  { %2223 = vsyncpa [#allocation10 + $0x1], 1 }
0x11ed   :  { %2224 = vsyncpa [#allocation13], 1 }
0x11ee   :  { %2226 = vsyncpa [#allocation13 + $0x1], 1 }
0x11ef   :  { %2227 = vsyncpa [#allocation16], 1 }
0x11f0   :  { %2229 = vsyncpa [#allocation16 + $0x1], 1 }
0x11f1   :  { %2230 = vsyncpa [#allocation19], 1 }
0x11f2   :  { %2232 = vsyncpa [#allocation19 + $0x1], 1 }
0x11f3   :  { %2233 = vsyncpa [#allocation22], 1 }
0x11f4   :  { %2235 = vsyncpa [#allocation22 + $0x1], 1 }
0x11f5   :  { %2236 = vsyncpa [#allocation5], 1 }
0x11f6   :  { %2238 = vsyncpa [#allocation5 + $0x1], 1 }

</bundles_post_ra>
